<compile_context>
chip_gen: v7x
topology: tpu7x:2x2x1
jax: 0.10.0
libtpu: 0.0.40
codegen_flags: <defaults>
</compile_context>

<pallas_src>
import functools

import jax
import jax.numpy as jnp
from jax.experimental import pallas as pl
from jax.experimental.pallas import tpu as pltpu

block_size = 256            # upper bound on T (size of the module's causal-mask buffer)
n_embed = 384
num_heads = 6
head_size = n_embed // num_heads   # 64
NEG_INF = -1e30             # finite mask value (avoids -inf -> NaN on fully-masked rows)


def mha_kernel(x_ref, wqkv_ref, wproj_ref, bias_ref, mask_ref, o_ref, *, H, hs):
    TB, T, C = x_ref.shape
    M = TB * T

    # ---- Fused QKV projection: one full-width MXU matmul (K=C=384, N=3C=1152). ----
    x2d = x_ref[...].reshape(M, C).astype(jnp.bfloat16)
    qkv = jnp.dot(x2d, wqkv_ref[...], preferred_element_type=jnp.float32)   # (M, 3C) f32

    mask = mask_ref[...]                       # (T, T) additive causal mask (0 / -1e30)

    # ---- Per-(batch, head) attention (unrolled; TB and H are small statics). ----
    # NOTE: the score/PV matmuls have K/N = hs = 64; on v5e a further 2-head packing
    # would fill the 128-wide MXU — left as a follow-up, the projections dominate.
    batch_outs = []
    for b in range(TB):
        r0 = b * T
        head_outs = []
        for h in range(H):
            q = qkv[r0:r0 + T, h * hs:(h + 1) * hs]                    # scale folded into W_q
            k = qkv[r0:r0 + T, C + h * hs:C + (h + 1) * hs]
            v = qkv[r0:r0 + T, 2 * C + h * hs:2 * C + (h + 1) * hs]

            s = jax.lax.dot_general(                                   # q @ k^T  -> (T, T)
                q.astype(jnp.bfloat16), k.astype(jnp.bfloat16),
                dimension_numbers=(((1,), (1,)), ((), ())),
                preferred_element_type=jnp.float32)
            s = s + mask                                               # causal mask (additive)
            s = s - jnp.max(s, axis=-1, keepdims=True)                 # stable softmax, f32
            p = jnp.exp(s)
            inv = pl.reciprocal(jnp.sum(p, axis=-1, keepdims=True), approx=True)
            p = p * inv
            head_outs.append(                                          # p @ v  -> (T, hs)
                jnp.dot(p.astype(jnp.bfloat16), v.astype(jnp.bfloat16),
                        preferred_element_type=jnp.float32))
        batch_outs.append(jnp.concatenate(head_outs, axis=-1))         # (T, C)
    attn = batch_outs[0] if TB == 1 else jnp.concatenate(batch_outs, axis=0)   # (M, C)

    # ---- Output projection: one full-width MXU matmul (K=C, N=C) + bias. ----
    out = jnp.dot(attn.astype(jnp.bfloat16), wproj_ref[...],
                  preferred_element_type=jnp.float32)                  # (M, C) f32
    out = out + bias_ref[...]                                          # (1, C) broadcast
    o_ref[...] = out.reshape(TB, T, C).astype(o_ref.dtype)


def multi_head_attention(x, wq, wk, wv, wp, bp, *, batch_tile=1):
    """x: (B, T, C); wq/wk/wv: (H, C, hs); wp: (H, hs, C); bp: (1, C)."""
    B, T, C = x.shape
    H, _, hs = wq.shape
    assert T <= block_size and C == H * hs and B % batch_tile == 0

    scale = jnp.asarray(hs, jnp.float32) ** -0.5
    # Stacked QKV weight (C, 3C): [W_q * scale | W_k | W_v], heads contiguous (hs cols each).
    wq_f = (wq.astype(jnp.float32) * scale).transpose(1, 0, 2).reshape(C, H * hs)
    wk_f = wk.astype(jnp.float32).transpose(1, 0, 2).reshape(C, H * hs)
    wv_f = wv.astype(jnp.float32).transpose(1, 0, 2).reshape(C, H * hs)
    w_qkv = jnp.concatenate([wq_f, wk_f, wv_f], axis=1).astype(jnp.bfloat16)   # (C, 3C)
    w_proj = wp.reshape(H * hs, C).astype(jnp.bfloat16)                        # (C, C)
    bias = bp.reshape(1, C).astype(jnp.float32)

    # Additive causal mask, built once (finite large-negative, not -inf).
    tril = jnp.tril(jnp.ones((T, T), dtype=bool))
    mask = jnp.where(tril, 0.0, NEG_INF).astype(jnp.float32)

    kernel = functools.partial(mha_kernel, H=H, hs=hs)
    return pl.pallas_call(
        kernel,
        out_shape=jax.ShapeDtypeStruct((B, T, C), x.dtype),
        grid_spec=pltpu.PrefetchScalarGridSpec(
            num_scalar_prefetch=0,
            grid=(B // batch_tile,),
            in_specs=[
                pl.BlockSpec((batch_tile, T, C), lambda b: (b, 0, 0)),   # x batch tile
                pl.BlockSpec((C, 3 * C), lambda b: (0, 0)),              # fused QKV weight (resident)
                pl.BlockSpec((C, C), lambda b: (0, 0)),                  # output projection (resident)
                pl.BlockSpec((1, C), lambda b: (0, 0)),                  # projection bias (resident)
                pl.BlockSpec((T, T), lambda b: (0, 0)),                  # additive causal mask (resident)
            ],
            out_specs=pl.BlockSpec((batch_tile, T, C), lambda b: (b, 0, 0)),
        ),
        compiler_params=pltpu.CompilerParams(
            dimension_semantics=("parallel",)),   # batch tiles independent -> megacore / v7x 2-TC
    )(x, w_qkv, w_proj, bias, mask)


def reference_mha(x, wq, wk, wv, wp, bp):
    """Pure-JAX f32 reference mirroring the PyTorch forward (eval mode)."""
    B, T, C = x.shape
    H, _, hs = wq.shape
    mask = jnp.tril(jnp.ones((T, T), dtype=bool))
    outs = []
    for h in range(H):
        q = x @ wq[h]
        k = x @ wk[h]
        v = x @ wv[h]
        wei = (q @ jnp.swapaxes(k, -1, -2)) * (hs ** -0.5)
        wei = jnp.where(mask[None], wei, -jnp.inf)
        wei = jax.nn.softmax(wei, axis=-1)
        outs.append(wei @ v)
    cat = jnp.concatenate(outs, axis=-1)                    # (B, T, C)
    return cat @ wp.reshape(H * hs, C) + bp[0][None, None, :]


if __name__ == "__main__":
    B, T = 2, 8   # small batch / seq; C = n_embed = 384 as the module hardcodes

    key = jax.random.PRNGKey(0)
    kx, kq, kk, kv, kp, kb = jax.random.split(key, 6)

    x = jax.random.normal(kx, (B, T, n_embed), jnp.float32)
    # nn.Linear(n_embed, head_size, bias=False) per head -> stored pre-transposed (C, hs)
    wq = jax.random.normal(kq, (num_heads, n_embed, head_size), jnp.float32) * 0.02
    wk = jax.random.normal(kk, (num_heads, n_embed, head_size), jnp.float32) * 0.02
    wv = jax.random.normal(kv, (num_heads, n_embed, head_size), jnp.float32) * 0.02
    # nn.Linear(n_embed, n_embed) projection, split into per-head (hs, C) slices
    wp = jax.random.normal(kp, (num_heads, head_size, n_embed), jnp.float32) * 0.02
    bp = jax.random.normal(kb, (1, n_embed), jnp.float32) * 0.02

    out = multi_head_attention(x, wq, wk, wv, wp, bp, batch_tile=1)
    out = jax.block_until_ready(out)

    ref = reference_mha(x, wq, wk, wv, wp, bp)
    assert out.shape == (B, T, n_embed)
    assert not jnp.any(jnp.isnan(out)), "NaN in kernel output"
    # bf16 matmul operands + approx reciprocal -> relaxed (but still tight) tolerance vs f32 ref.
    assert jnp.allclose(out, ref, atol=2e-2, rtol=2e-2), "mismatch vs reference"

    print("KERNEL_OK")
</pallas_src>

<mosaic_0001>
module attributes {stable_mosaic.version = 11 : i64} {
  func.func @mha_kernel(%arg0: i32, %arg1: memref<1x8x384xf32, #tpu.memory_space<vmem>>, %arg2: memref<384x1152xbf16, #tpu.memory_space<vmem>>, %arg3: memref<384x384xbf16, #tpu.memory_space<vmem>>, %arg4: memref<1x384xf32, #tpu.memory_space<vmem>>, %arg5: memref<8x8xf32, #tpu.memory_space<vmem>>, %arg6: memref<1x8x384xf32, #tpu.memory_space<vmem>>) attributes {dimension_semantics = [#tpu.dimension_semantics<parallel>], iteration_bounds = array<i64: 2>, scalar_prefetch = 0 : i64, scratch_operands = 0 : i64, tpu.core_type = #tpu.core_type<tc>, window_params = [{transform_indices = @transform_0, window_bounds = array<i64: 1, 8, 384>}, {pipeline_mode = #tpu.pipeline_mode<synchronous>, transform_indices = @transform_1, window_bounds = array<i64: 384, 1152>}, {pipeline_mode = #tpu.pipeline_mode<synchronous>, transform_indices = @transform_2, window_bounds = array<i64: 384, 384>}, {pipeline_mode = #tpu.pipeline_mode<synchronous>, transform_indices = @transform_3, window_bounds = array<i64: 1, 384>}, {pipeline_mode = #tpu.pipeline_mode<synchronous>, transform_indices = @transform_4, window_bounds = array<i64: 8, 8>}, {transform_indices = @transform_5, window_bounds = array<i64: 1, 8, 384>}]} {
    %c0 = arith.constant 0 : index
    %c0_0 = arith.constant 0 : index
    %c0_1 = arith.constant 0 : index
    %0 = vector.load %arg1[%c0, %c0_0, %c0_1] : memref<1x8x384xf32, #tpu.memory_space<vmem>>, vector<1x8x384xf32>
    %1 = vector.shape_cast %0 : vector<1x8x384xf32> to vector<8x384xf32>
    %2 = arith.truncf %1 : vector<8x384xf32> to vector<8x384xbf16>
    %c0_2 = arith.constant 0 : index
    %c0_3 = arith.constant 0 : index
    %3 = vector.load %arg2[%c0_2, %c0_3] : memref<384x1152xbf16, #tpu.memory_space<vmem>>, vector<384x1152xbf16>
    %cst = arith.constant dense<0.000000e+00> : vector<8x1152xf32>
    %4 = tpu.matmul %2, %3, %cst {dimension_numbers = #tpu.dot_dimension_numbers<[1], [0], [0], [1], [0, 0, 1, 1], [], []>} : vector<8x384xbf16>, vector<384x1152xbf16>, vector<8x1152xf32> -> vector<8x1152xf32>
    %c0_4 = arith.constant 0 : index
    %c0_5 = arith.constant 0 : index
    %5 = vector.load %arg5[%c0_4, %c0_5] : memref<8x8xf32, #tpu.memory_space<vmem>>, vector<8x8xf32>
    %6 = vector.extract_strided_slice %4 {offsets = [0, 0], sizes = [8, 64], strides = [1, 1]} : vector<8x1152xf32> to vector<8x64xf32>
    %7 = vector.extract_strided_slice %4 {offsets = [0, 384], sizes = [8, 64], strides = [1, 1]} : vector<8x1152xf32> to vector<8x64xf32>
    %8 = vector.extract_strided_slice %4 {offsets = [0, 768], sizes = [8, 64], strides = [1, 1]} : vector<8x1152xf32> to vector<8x64xf32>
    %9 = arith.truncf %6 : vector<8x64xf32> to vector<8x64xbf16>
    %10 = arith.truncf %7 : vector<8x64xf32> to vector<8x64xbf16>
    %cst_6 = arith.constant dense<0.000000e+00> : vector<8x8xf32>
    %11 = tpu.matmul %9, %10, %cst_6 {dimension_numbers = #tpu.dot_dimension_numbers<[1], [1], [0], [0], [0, 0, 1, 0], [], []>} : vector<8x64xbf16>, vector<8x64xbf16>, vector<8x8xf32> -> vector<8x8xf32>
    %12 = arith.addf %11, %5 : vector<8x8xf32>
    %cst_7 = arith.constant dense<0xFF800000> : vector<8xf32>
    %13 = vector.multi_reduction <maximumf>, %12, %cst_7 [1] : vector<8x8xf32> to vector<8xf32>
    %14 = vector.shape_cast %13 : vector<8xf32> to vector<8x1xf32>
    %15 = vector.broadcast %14 : vector<8x1xf32> to vector<8x8xf32>
    %16 = arith.subf %12, %15 : vector<8x8xf32>
    %17 = math.exp %16 : vector<8x8xf32>
    %cst_8 = arith.constant dense<0.000000e+00> : vector<8xf32>
    %18 = vector.multi_reduction <add>, %17, %cst_8 [1] : vector<8x8xf32> to vector<8xf32>
    %19 = vector.shape_cast %18 : vector<8xf32> to vector<8x1xf32>
    %20 = tpu.reciprocal %19 {approx = true} : vector<8x1xf32> -> vector<8x1xf32>
    %21 = vector.broadcast %20 : vector<8x1xf32> to vector<8x8xf32>
    %22 = arith.mulf %17, %21 : vector<8x8xf32>
    %23 = arith.truncf %22 : vector<8x8xf32> to vector<8x8xbf16>
    %24 = arith.truncf %8 : vector<8x64xf32> to vector<8x64xbf16>
    %cst_9 = arith.constant dense<0.000000e+00> : vector<8x64xf32>
    %25 = tpu.matmul %23, %24, %cst_9 {dimension_numbers = #tpu.dot_dimension_numbers<[1], [0], [0], [1], [0, 0, 1, 1], [], []>} : vector<8x8xbf16>, vector<8x64xbf16>, vector<8x64xf32> -> vector<8x64xf32>
    %26 = vector.extract_strided_slice %4 {offsets = [0, 64], sizes = [8, 64], strides = [1, 1]} : vector<8x1152xf32> to vector<8x64xf32>
    %27 = vector.extract_strided_slice %4 {offsets = [0, 448], sizes = [8, 64], strides = [1, 1]} : vector<8x1152xf32> to vector<8x64xf32>
    %28 = vector.extract_strided_slice %4 {offsets = [0, 832], sizes = [8, 64], strides = [1, 1]} : vector<8x1152xf32> to vector<8x64xf32>
    %29 = arith.truncf %26 : vector<8x64xf32> to vector<8x64xbf16>
    %30 = arith.truncf %27 : vector<8x64xf32> to vector<8x64xbf16>
    %cst_10 = arith.constant dense<0.000000e+00> : vector<8x8xf32>
    %31 = tpu.matmul %29, %30, %cst_10 {dimension_numbers = #tpu.dot_dimension_numbers<[1], [1], [0], [0], [0, 0, 1, 0], [], []>} : vector<8x64xbf16>, vector<8x64xbf16>, vector<8x8xf32> -> vector<8x8xf32>
    %32 = arith.addf %31, %5 : vector<8x8xf32>
    %cst_11 = arith.constant dense<0xFF800000> : vector<8xf32>
    %33 = vector.multi_reduction <maximumf>, %32, %cst_11 [1] : vector<8x8xf32> to vector<8xf32>
    %34 = vector.shape_cast %33 : vector<8xf32> to vector<8x1xf32>
    %35 = vector.broadcast %34 : vector<8x1xf32> to vector<8x8xf32>
    %36 = arith.subf %32, %35 : vector<8x8xf32>
    %37 = math.exp %36 : vector<8x8xf32>
    %cst_12 = arith.constant dense<0.000000e+00> : vector<8xf32>
    %38 = vector.multi_reduction <add>, %37, %cst_12 [1] : vector<8x8xf32> to vector<8xf32>
    %39 = vector.shape_cast %38 : vector<8xf32> to vector<8x1xf32>
    %40 = tpu.reciprocal %39 {approx = true} : vector<8x1xf32> -> vector<8x1xf32>
    %41 = vector.broadcast %40 : vector<8x1xf32> to vector<8x8xf32>
    %42 = arith.mulf %37, %41 : vector<8x8xf32>
    %43 = arith.truncf %42 : vector<8x8xf32> to vector<8x8xbf16>
    %44 = arith.truncf %28 : vector<8x64xf32> to vector<8x64xbf16>
    %cst_13 = arith.constant dense<0.000000e+00> : vector<8x64xf32>
    %45 = tpu.matmul %43, %44, %cst_13 {dimension_numbers = #tpu.dot_dimension_numbers<[1], [0], [0], [1], [0, 0, 1, 1], [], []>} : vector<8x8xbf16>, vector<8x64xbf16>, vector<8x64xf32> -> vector<8x64xf32>
    %46 = vector.extract_strided_slice %4 {offsets = [0, 128], sizes = [8, 64], strides = [1, 1]} : vector<8x1152xf32> to vector<8x64xf32>
    %47 = vector.extract_strided_slice %4 {offsets = [0, 512], sizes = [8, 64], strides = [1, 1]} : vector<8x1152xf32> to vector<8x64xf32>
    %48 = vector.extract_strided_slice %4 {offsets = [0, 896], sizes = [8, 64], strides = [1, 1]} : vector<8x1152xf32> to vector<8x64xf32>
    %49 = arith.truncf %46 : vector<8x64xf32> to vector<8x64xbf16>
    %50 = arith.truncf %47 : vector<8x64xf32> to vector<8x64xbf16>
    %cst_14 = arith.constant dense<0.000000e+00> : vector<8x8xf32>
    %51 = tpu.matmul %49, %50, %cst_14 {dimension_numbers = #tpu.dot_dimension_numbers<[1], [1], [0], [0], [0, 0, 1, 0], [], []>} : vector<8x64xbf16>, vector<8x64xbf16>, vector<8x8xf32> -> vector<8x8xf32>
    %52 = arith.addf %51, %5 : vector<8x8xf32>
    %cst_15 = arith.constant dense<0xFF800000> : vector<8xf32>
    %53 = vector.multi_reduction <maximumf>, %52, %cst_15 [1] : vector<8x8xf32> to vector<8xf32>
    %54 = vector.shape_cast %53 : vector<8xf32> to vector<8x1xf32>
    %55 = vector.broadcast %54 : vector<8x1xf32> to vector<8x8xf32>
    %56 = arith.subf %52, %55 : vector<8x8xf32>
    %57 = math.exp %56 : vector<8x8xf32>
    %cst_16 = arith.constant dense<0.000000e+00> : vector<8xf32>
    %58 = vector.multi_reduction <add>, %57, %cst_16 [1] : vector<8x8xf32> to vector<8xf32>
    %59 = vector.shape_cast %58 : vector<8xf32> to vector<8x1xf32>
    %60 = tpu.reciprocal %59 {approx = true} : vector<8x1xf32> -> vector<8x1xf32>
    %61 = vector.broadcast %60 : vector<8x1xf32> to vector<8x8xf32>
    %62 = arith.mulf %57, %61 : vector<8x8xf32>
    %63 = arith.truncf %62 : vector<8x8xf32> to vector<8x8xbf16>
    %64 = arith.truncf %48 : vector<8x64xf32> to vector<8x64xbf16>
    %cst_17 = arith.constant dense<0.000000e+00> : vector<8x64xf32>
    %65 = tpu.matmul %63, %64, %cst_17 {dimension_numbers = #tpu.dot_dimension_numbers<[1], [0], [0], [1], [0, 0, 1, 1], [], []>} : vector<8x8xbf16>, vector<8x64xbf16>, vector<8x64xf32> -> vector<8x64xf32>
    %66 = vector.extract_strided_slice %4 {offsets = [0, 192], sizes = [8, 64], strides = [1, 1]} : vector<8x1152xf32> to vector<8x64xf32>
    %67 = vector.extract_strided_slice %4 {offsets = [0, 576], sizes = [8, 64], strides = [1, 1]} : vector<8x1152xf32> to vector<8x64xf32>
    %68 = vector.extract_strided_slice %4 {offsets = [0, 960], sizes = [8, 64], strides = [1, 1]} : vector<8x1152xf32> to vector<8x64xf32>
    %69 = arith.truncf %66 : vector<8x64xf32> to vector<8x64xbf16>
    %70 = arith.truncf %67 : vector<8x64xf32> to vector<8x64xbf16>
    %cst_18 = arith.constant dense<0.000000e+00> : vector<8x8xf32>
    %71 = tpu.matmul %69, %70, %cst_18 {dimension_numbers = #tpu.dot_dimension_numbers<[1], [1], [0], [0], [0, 0, 1, 0], [], []>} : vector<8x64xbf16>, vector<8x64xbf16>, vector<8x8xf32> -> vector<8x8xf32>
    %72 = arith.addf %71, %5 : vector<8x8xf32>
    %cst_19 = arith.constant dense<0xFF800000> : vector<8xf32>
    %73 = vector.multi_reduction <maximumf>, %72, %cst_19 [1] : vector<8x8xf32> to vector<8xf32>
    %74 = vector.shape_cast %73 : vector<8xf32> to vector<8x1xf32>
    %75 = vector.broadcast %74 : vector<8x1xf32> to vector<8x8xf32>
    %76 = arith.subf %72, %75 : vector<8x8xf32>
    %77 = math.exp %76 : vector<8x8xf32>
    %cst_20 = arith.constant dense<0.000000e+00> : vector<8xf32>
    %78 = vector.multi_reduction <add>, %77, %cst_20 [1] : vector<8x8xf32> to vector<8xf32>
    %79 = vector.shape_cast %78 : vector<8xf32> to vector<8x1xf32>
    %80 = tpu.reciprocal %79 {approx = true} : vector<8x1xf32> -> vector<8x1xf32>
    %81 = vector.broadcast %80 : vector<8x1xf32> to vector<8x8xf32>
    %82 = arith.mulf %77, %81 : vector<8x8xf32>
    %83 = arith.truncf %82 : vector<8x8xf32> to vector<8x8xbf16>
    %84 = arith.truncf %68 : vector<8x64xf32> to vector<8x64xbf16>
    %cst_21 = arith.constant dense<0.000000e+00> : vector<8x64xf32>
    %85 = tpu.matmul %83, %84, %cst_21 {dimension_numbers = #tpu.dot_dimension_numbers<[1], [0], [0], [1], [0, 0, 1, 1], [], []>} : vector<8x8xbf16>, vector<8x64xbf16>, vector<8x64xf32> -> vector<8x64xf32>
    %86 = vector.extract_strided_slice %4 {offsets = [0, 256], sizes = [8, 64], strides = [1, 1]} : vector<8x1152xf32> to vector<8x64xf32>
    %87 = vector.extract_strided_slice %4 {offsets = [0, 640], sizes = [8, 64], strides = [1, 1]} : vector<8x1152xf32> to vector<8x64xf32>
    %88 = vector.extract_strided_slice %4 {offsets = [0, 1024], sizes = [8, 64], strides = [1, 1]} : vector<8x1152xf32> to vector<8x64xf32>
    %89 = arith.truncf %86 : vector<8x64xf32> to vector<8x64xbf16>
    %90 = arith.truncf %87 : vector<8x64xf32> to vector<8x64xbf16>
    %cst_22 = arith.constant dense<0.000000e+00> : vector<8x8xf32>
    %91 = tpu.matmul %89, %90, %cst_22 {dimension_numbers = #tpu.dot_dimension_numbers<[1], [1], [0], [0], [0, 0, 1, 0], [], []>} : vector<8x64xbf16>, vector<8x64xbf16>, vector<8x8xf32> -> vector<8x8xf32>
    %92 = arith.addf %91, %5 : vector<8x8xf32>
    %cst_23 = arith.constant dense<0xFF800000> : vector<8xf32>
    %93 = vector.multi_reduction <maximumf>, %92, %cst_23 [1] : vector<8x8xf32> to vector<8xf32>
    %94 = vector.shape_cast %93 : vector<8xf32> to vector<8x1xf32>
    %95 = vector.broadcast %94 : vector<8x1xf32> to vector<8x8xf32>
    %96 = arith.subf %92, %95 : vector<8x8xf32>
    %97 = math.exp %96 : vector<8x8xf32>
    %cst_24 = arith.constant dense<0.000000e+00> : vector<8xf32>
    %98 = vector.multi_reduction <add>, %97, %cst_24 [1] : vector<8x8xf32> to vector<8xf32>
    %99 = vector.shape_cast %98 : vector<8xf32> to vector<8x1xf32>
    %100 = tpu.reciprocal %99 {approx = true} : vector<8x1xf32> -> vector<8x1xf32>
    %101 = vector.broadcast %100 : vector<8x1xf32> to vector<8x8xf32>
    %102 = arith.mulf %97, %101 : vector<8x8xf32>
    %103 = arith.truncf %102 : vector<8x8xf32> to vector<8x8xbf16>
    %104 = arith.truncf %88 : vector<8x64xf32> to vector<8x64xbf16>
    %cst_25 = arith.constant dense<0.000000e+00> : vector<8x64xf32>
    %105 = tpu.matmul %103, %104, %cst_25 {dimension_numbers = #tpu.dot_dimension_numbers<[1], [0], [0], [1], [0, 0, 1, 1], [], []>} : vector<8x8xbf16>, vector<8x64xbf16>, vector<8x64xf32> -> vector<8x64xf32>
    %106 = vector.extract_strided_slice %4 {offsets = [0, 320], sizes = [8, 64], strides = [1, 1]} : vector<8x1152xf32> to vector<8x64xf32>
    %107 = vector.extract_strided_slice %4 {offsets = [0, 704], sizes = [8, 64], strides = [1, 1]} : vector<8x1152xf32> to vector<8x64xf32>
    %108 = vector.extract_strided_slice %4 {offsets = [0, 1088], sizes = [8, 64], strides = [1, 1]} : vector<8x1152xf32> to vector<8x64xf32>
    %109 = arith.truncf %106 : vector<8x64xf32> to vector<8x64xbf16>
    %110 = arith.truncf %107 : vector<8x64xf32> to vector<8x64xbf16>
    %cst_26 = arith.constant dense<0.000000e+00> : vector<8x8xf32>
    %111 = tpu.matmul %109, %110, %cst_26 {dimension_numbers = #tpu.dot_dimension_numbers<[1], [1], [0], [0], [0, 0, 1, 0], [], []>} : vector<8x64xbf16>, vector<8x64xbf16>, vector<8x8xf32> -> vector<8x8xf32>
    %112 = arith.addf %111, %5 : vector<8x8xf32>
    %cst_27 = arith.constant dense<0xFF800000> : vector<8xf32>
    %113 = vector.multi_reduction <maximumf>, %112, %cst_27 [1] : vector<8x8xf32> to vector<8xf32>
    %114 = vector.shape_cast %113 : vector<8xf32> to vector<8x1xf32>
    %115 = vector.broadcast %114 : vector<8x1xf32> to vector<8x8xf32>
    %116 = arith.subf %112, %115 : vector<8x8xf32>
    %117 = math.exp %116 : vector<8x8xf32>
    %cst_28 = arith.constant dense<0.000000e+00> : vector<8xf32>
    %118 = vector.multi_reduction <add>, %117, %cst_28 [1] : vector<8x8xf32> to vector<8xf32>
    %119 = vector.shape_cast %118 : vector<8xf32> to vector<8x1xf32>
    %120 = tpu.reciprocal %119 {approx = true} : vector<8x1xf32> -> vector<8x1xf32>
    %121 = vector.broadcast %120 : vector<8x1xf32> to vector<8x8xf32>
    %122 = arith.mulf %117, %121 : vector<8x8xf32>
    %123 = arith.truncf %122 : vector<8x8xf32> to vector<8x8xbf16>
    %124 = arith.truncf %108 : vector<8x64xf32> to vector<8x64xbf16>
    %cst_29 = arith.constant dense<0.000000e+00> : vector<8x64xf32>
    %125 = tpu.matmul %123, %124, %cst_29 {dimension_numbers = #tpu.dot_dimension_numbers<[1], [0], [0], [1], [0, 0, 1, 1], [], []>} : vector<8x8xbf16>, vector<8x64xbf16>, vector<8x64xf32> -> vector<8x64xf32>
    %126 = tpu.concatenate %25, %45, %65, %85, %105, %125 in 1 : vector<8x64xf32>, vector<8x64xf32>, vector<8x64xf32>, vector<8x64xf32>, vector<8x64xf32>, vector<8x64xf32> -> vector<8x384xf32>
    %127 = arith.truncf %126 : vector<8x384xf32> to vector<8x384xbf16>
    %c0_30 = arith.constant 0 : index
    %c0_31 = arith.constant 0 : index
    %128 = vector.load %arg3[%c0_30, %c0_31] : memref<384x384xbf16, #tpu.memory_space<vmem>>, vector<384x384xbf16>
    %cst_32 = arith.constant dense<0.000000e+00> : vector<8x384xf32>
    %129 = tpu.matmul %127, %128, %cst_32 {dimension_numbers = #tpu.dot_dimension_numbers<[1], [0], [0], [1], [0, 0, 1, 1], [], []>} : vector<8x384xbf16>, vector<384x384xbf16>, vector<8x384xf32> -> vector<8x384xf32>
    %c0_33 = arith.constant 0 : index
    %c0_34 = arith.constant 0 : index
    %130 = vector.load %arg4[%c0_33, %c0_34] : memref<1x384xf32, #tpu.memory_space<vmem>>, vector<1x384xf32>
    %131 = vector.broadcast %130 : vector<1x384xf32> to vector<8x384xf32>
    %132 = arith.addf %129, %131 : vector<8x384xf32>
    %133 = vector.shape_cast %132 : vector<8x384xf32> to vector<1x8x384xf32>
    %c0_35 = arith.constant 0 : index
    %c0_36 = arith.constant 0 : index
    %c0_37 = arith.constant 0 : index
    %134 = vector.load %arg6[%c0_35, %c0_36, %c0_37] : memref<1x8x384xf32, #tpu.memory_space<vmem>>, vector<1x8x384xf32>
    tpu.vector_store %arg6[%c0_35, %c0_36, %c0_37], %133 {strides = array<i32>} : memref<1x8x384xf32, #tpu.memory_space<vmem>>, vector<1x8x384xf32>,
    return
  }
  func.func @transform_0(%arg0: i32) -> (i32, i32, i32) {
    %c0_i32 = arith.constant 0 : i32
    %c0_i32_0 = arith.constant 0 : i32
    %c0_i32_1 = arith.constant 0 : i32
    return %arg0, %c0_i32, %c0_i32_0 : i32, i32, i32
  }
  func.func @transform_1(%arg0: i32) -> (i32, i32) {
    %c0_i32 = arith.constant 0 : i32
    %c0_i32_0 = arith.constant 0 : i32
    %c0_i32_1 = arith.constant 0 : i32
    return %c0_i32, %c0_i32_0 : i32, i32
  }
  func.func @transform_2(%arg0: i32) -> (i32, i32) {
    %c0_i32 = arith.constant 0 : i32
    %c0_i32_0 = arith.constant 0 : i32
    %c0_i32_1 = arith.constant 0 : i32
    return %c0_i32, %c0_i32_0 : i32, i32
  }
  func.func @transform_3(%arg0: i32) -> (i32, i32) {
    %c0_i32 = arith.constant 0 : i32
    %c0_i32_0 = arith.constant 0 : i32
    %c0_i32_1 = arith.constant 0 : i32
    return %c0_i32, %c0_i32_0 : i32, i32
  }
  func.func @transform_4(%arg0: i32) -> (i32, i32) {
    %c0_i32 = arith.constant 0 : i32
    %c0_i32_0 = arith.constant 0 : i32
    %c0_i32_1 = arith.constant 0 : i32
    return %c0_i32, %c0_i32_0 : i32, i32
  }
  func.func @transform_5(%arg0: i32) -> (i32, i32, i32) {
    %c0_i32 = arith.constant 0 : i32
    %c0_i32_0 = arith.constant 0 : i32
    %c0_i32_1 = arith.constant 0 : i32
    return %arg0, %c0_i32, %c0_i32_0 : i32, i32, i32
  }
}

</mosaic_0001>

<bundles_post_ra>
// kernel: tpu_custom_call.1
= control target key start
LH: loop header
LB: loop body
LE: loop exit
PB: predicated region body
PF: predicated region fallthrough
CT: control target
= control target key end

     0   :  { %10 = vsyncpa [#allocation3], 0  ;;  %s5135_s0 = inlined_call_operand.hbm [shape: f32[2,8,384], index: 0, kind: input, shape index: {}]   ;;  %s5136_s1 = inlined_call_operand.hbm [shape: bf16[384,1152], index: 1, kind: input, shape index: {}]   ;;  %s5137_s2 = inlined_call_operand.hbm [shape: bf16[384,384], index: 2, kind: input, shape index: {}]   ;;  %s5138_s3 = inlined_call_operand.vmem [shape: f32[1,384], index: 3, kind: input, shape index: {}]   ;;  %s5139_s4 = inlined_call_operand.vmem [shape: f32[8,8], index: 4, kind: input, shape index: {}]   ;;  %s5140_s5 = inlined_call_operand.hbm [shape: f32[2,8,384], index: 5, kind: output, shape index: {}]  }
   0x1   :  { %12 = vsyncpa [#allocation3 + $0x1], 0 }
   0x2   :  { %13 = vsyncpa [#allocation6], 0 }
   0x3   :  { %14 = vsyncpa [#allocation4], 0 }
   0x4   :  { %16 = vsyncpa [#allocation4 + $0x1], 0  ;;  %s4725_s18 = smov 0   ;;  %s4727_s19 = smov 0  }
   0x5   :  { %s4729_s20 = smov 0   ;;  %s4731_s21 = smov 0  }
   0x6 LB: > { %s4746_s22 = sadd.s32 4294967295, %s4681_s21   ;;  %s3477_s23 = sadd.s32 4294967294, %s4681_s21   ;;  %s4681_s21 = sphi %s4731_s21, %s5160_s21   ;;  %s4677_s20 = sphi %s4729_s20, %s5159_s20   ;;  %s4673_s19 = sphi %s4727_s19, %s5158_s19   ;;  %s4669_s18 = sphi %s4725_s18, %s5157_s18  }
   0x7   : > { %p42_p0 = scmp.ne.s32.totalorder %s4673_s19, %s4669_s18  ;;  %p5141_p1 = scmp.eq.s32.totalorder %s4746_s22, 0 }
   0x8   : > { %p156_p3 = scmp.eq.s32.totalorder %s3477_s23, 1  ;;  %p3478_p5 = scmp.ge.s32.totalorder %s4681_s21, 1 }
   0x9   : > { %p4755_p4 = por %p5141_p1, %p42_p0  ;;  %p163_p7 = scmp.lt.s32.totalorder %s4681_s21, 3 }
   0xa   : > { %p4760_p6 = por %p156_p3, %p42_p0  ;;  %s4683_s27 = smov [#allocation5]  }
   0xb   : > { %s5144_s24 = scalar_select %p4755_p4, 1, 0 }
   0xc   : > { %s5145_s25 = scalar_select %p4760_p6, 1, 0 }
   0xd   : > { %p4765_p8 = pnand %p3478_p5, %p163_p7  ;;  %s175_s28 = sshll.u32 %s4683_s27, 4  ;;  %s4769_s28 = int_to_ptr.vmem [resolvable:$true] %s175_s28 }
   0xe   : > { %s4684_s30 = smov [#allocation7]   ;;  %s4525_s9 = scalar_lea.hbm %s5136_s1, 27648 }
   0xf   : > { %p4025_p9 = pneg %p4765_p8  ;;  %s188_s6 = sshll.u32 %s4684_s30, 4  ;;  %s4780_s6 = int_to_ptr.vmem [resolvable:$true] %s188_s6 }
  0x10   : > { %p4526_p12 = scmp.ne.s32.totalorder %s5136_s1, %s4525_s9  ;;  %p4532_p5 = scmp.lt.u32.totalorder %s4525_s9, %s5136_s1 }
  0x11   : > { %p4776_p11 = pnand %p4025_p9, %p5141_p1 }
  0x13   : > { %p4527_p13 = pneg %p4776_p11 }
  0x15   : > { %p4528_p0 = pnand %p4527_p13, %p4526_p12 }
  0x17   : > { %p4529_p3 = pneg %p4528_p0 }
  0x19   : > { %p4534_p7 = pnand %p4532_p5, %p4529_p3 }
  0x1b   : > { %4537 = shalt.err (!%p4534_p7)
}
  0x1c   : > { %s4538_s14 = scalar_lea.vmem %s4769_s28, 27648  ;;  %p4546_p2 = scmp.lt.s32.totalorder %s4769_s28, %s4769_s28 }
  0x1d   : > { %p4539_p9 = scmp.ne.s32.totalorder %s4769_s28, %s4538_s14  ;;  %p4547_p12 = scmp.lt.s32.totalorder %s4538_s14, %s4538_s14 }
  0x1f   : > { %p4541_p10 = pnand %p4539_p9, %p4527_p13  ;;  %p4548_p0 = por %p4547_p12, %p4546_p2 }
  0x21   : > { %p4542_p1 = pneg %p4541_p10 }
  0x23   : > { %p4549_p6 = pnand %p4548_p0, %p4542_p1 }
  0x25   : > { %4552 = shalt.err (!%p4549_p6)
}
  0x26   : > { %s4685_s15 = smov 576   ;;  %s4686_s16 = smov 36  }
  0x27   : > { %4028 = dma.hbm_to_vmem [thread:$0]  (!%p4776_p11), %s5136_s1, 27648, %s4769_s28, [#allocation6], %s4685_s15, %s4685_s15, %s4686_s16  }
  0x28   : > { %s4553_s7 = scalar_lea.hbm %s5137_s2, 9216 }
  0x29   : > { %p4554_p2 = scmp.ne.s32.totalorder %s5137_s2, %s4553_s7  ;;  %p4560_p10 = scmp.lt.u32.totalorder %s4553_s7, %s5137_s2 }
  0x2b   : > { %p4556_p1 = pnand %p4554_p2, %p4527_p13 }
  0x2d   : > { %p4557_p6 = pneg %p4556_p1 }
  0x2f   : > { %p4562_p3 = pnand %p4560_p10, %p4557_p6 }
  0x31   : > { %4565 = shalt.err (!%p4562_p3)
}
  0x32   : > { %s4566_s28 = scalar_lea.vmem %s4780_s6, 9216  ;;  %p4574_p12 = scmp.lt.s32.totalorder %s4780_s6, %s4780_s6 }
  0x33   : > { %p4567_p5 = scmp.ne.s32.totalorder %s4780_s6, %s4566_s28  ;;  %p4575_p0 = scmp.lt.s32.totalorder %s4566_s28, %s4566_s28 }
  0x35   : > { %p4569_p7 = pnand %p4567_p5, %p4527_p13  ;;  %p4576_p2 = por %p4575_p0, %p4574_p12 }
  0x37   : > { %p4570_p9 = pneg %p4569_p7 }
  0x39   : > { %p4577_p1 = pnand %p4576_p2, %p4570_p9 }
  0x3b   : > { %4580 = shalt.err (!%p4577_p1)
}
  0x3c   : > { %s4687_s12 = smov 192   ;;  %s4688_s13 = smov 12  }
  0x3d   : > { %4031 = dma.hbm_to_vmem [thread:$0]  (!%p4776_p11), %s5137_s2, 9216, %s4780_s6, [#allocation6], %s4687_s12, %s4687_s12, %s4688_s13  }
  0x3e   : > { %s4835_s16 = sadd.s32 1, %s4681_s21   ;;  %s29_s23 = sadd.s32 1, %s4677_s20 }
  0x3f   : > { %s26_s17 = ssub.s32 %s4681_s21, %s4835_s16  ;;  %p36_p6 = scmp.ne.s32.totalorder %s4677_s20, %s4673_s19 }
  0x40   : > { %p27_p13 = scmp.eq.s32.totalorder %s26_s17, 0  ;;  %p37_p10 = scmp.eq.s32.totalorder %s4681_s21, 0 }
  0x41   : > { %p5148_p5 = scmp.eq.s32.totalorder %s4746_s22, 1  ;;  %p4042_p9 = scmp.lt.s32.totalorder %s4681_s21, 2 }
  0x42   : > { %s4844_s27 = scalar_select %p27_p13, %s4677_s20, %s29_s23  }
  0x43   : > { %p38_p3 = por %p37_p10, %p36_p6  ;;  %p4848_p7 = por %p5148_p5, %p36_p6 }
  0x44   : > { %s208_s29 = sand.u32 1, %s4677_s20   ;;  %s4010_s6 = smul.u32 384, %s4681_s21 }
  0x45   : > { %s5149_s30 = scalar_select %p4848_p7, 1, 0 }
  0x46   : > { %s4009_s7 = smul.u32 24, %s208_s29  ;;  %p4855_p11 = pnand %p4042_p9, %p38_p3 }
  0x47   : > { %s4862_s11 = scalar_lea.hbm %s5135_s0, %s4010_s6  ;;  %s209_s13 = scalar_lea.sflag [#allocation3], %s208_s29 }
  0x48   : > { %s212_s28 = scalar_lea.vmem [#allocation2], %s4009_s7  ;;  %s4581_s14 = scalar_lea.hbm %s4862_s11, 384 }
  0x49   : > { %s220_s12 = sshll.u32 %s212_s28, 4  ;;  %p4582_p12 = scmp.ne.s32.totalorder %s4862_s11, %s4581_s14  ;;  %s4864_s12 = int_to_ptr.vmem [resolvable:$true] %s220_s12 }
  0x4a   : > { %p4583_p0 = pneg %p4855_p11  ;;  %s4586_s23 = scalar_lea.hbm %s5135_s0, 768 }
  0x4b   : > { %p4587_p13 = scmp.lt.u32.totalorder %s4862_s11, %s5135_s0  ;;  %p4588_p6 = scmp.lt.u32.totalorder %s4586_s23, %s4581_s14 }
  0x4c   : > { %p4584_p2 = pnand %p4583_p0, %p4582_p12  ;;  %p4590_p3 = scmp.lt.u32.totalorder %s4581_s14, %s4862_s11 }
  0x4d   : > { %p4589_p10 = por %p4588_p6, %p4587_p13 }
  0x4e   : > { %p4585_p1 = pneg %p4584_p2 }
  0x4f   : > { %p4591_p5 = por %p4590_p3, %p4589_p10 }
  0x51   : > { %p4592_p9 = pnand %p4591_p5, %p4585_p1 }
  0x53   : > { %4595 = shalt.err (!%p4592_p9)
}
  0x54   : > { %s4596_s29 = scalar_lea.vmem %s4864_s12, 384  ;;  %s4689_s7 = smov [#allocation2]  }
  0x55   : > { %p4597_p12 = scmp.ne.s32.totalorder %s4864_s12, %s4596_s29  ;;  %s4601_s10 = sshll.u32 %s4689_s7, 4  ;;  %s4602_s10 = int_to_ptr.vmem [resolvable:$false] %s4601_s10 }
  0x56   : > { %s4603_s28 = scalar_lea.vmem %s4602_s10, 768  ;;  %p4604_p4 = scmp.lt.s32.totalorder %s4864_s12, %s4602_s10 }
  0x57   : > { %p4599_p2 = pnand %p4597_p12, %p4583_p0  ;;  %p4605_p13 = scmp.lt.s32.totalorder %s4603_s28, %s4596_s29 }
  0x59   : > { %p4600_p7 = pneg %p4599_p2  ;;  %p4606_p6 = por %p4605_p13, %p4604_p4 }
  0x5b   : > { %p4607_p10 = pnand %p4606_p6, %p4600_p7 }
  0x5d   : > { %4610 = shalt.err (!%p4607_p10)
}
  0x5e   : > { %4035 = dma.hbm_to_vmem [thread:$0]  (!%p4855_p11), %s4862_s11, 384, %s4864_s12, %s209_s13  }
  0x5f   : > { %229 = sbr.rel (%p4765_p8) target bundleno = 2106 (0x83a), region = 40  ;;  %s4894_s14 = sand.u32 (!%p4765_p8), 1, %s4673_s19  }
  0x60   : > { %s4011_s15 = smul.u32 (!%p4765_p8), 24, %s4894_s14  ;;  %s232_s17 = scalar_lea.sflag (!%p4765_p8), [#allocation3], %s4894_s14 }
  0x61   : > { %p5151_p4 = scmp.ne.s32.totalorder (!%p4765_p8), %s5144_s24, 0 }
  0x62   : > { %s4900_s23 = scalar_lea.vmem (!%p4765_p8), [#allocation2], %s4011_s15 }
  0x66   : > { %4656 = dma.done.wait (%p5151_p4), %s232_s17, 384  }
  0x67   : > { %4658 = vsyncadd (%p5151_p4), %s232_s17, 4294966912  ;;  %p5152_p7 = scmp.eq.s32.totalorder %s4746_s22, 0 }
  0x69   : > { %4660 = dma.done.wait (%p5152_p7), [#allocation6], 36864   ;;  %p5153_p8 = pmov %p5152_p7 }
  0x6a   : > { %v4093_v0 = vld [vmem:[#allocation5 + $0x4] ss:$36 sps:$4 sm:$0xff]   ;;  %v4095_v1 = vld [vmem:[#allocation5 + $0xc] ss:$36 sps:$4 sm:$0xff]   ;;  %v4101_v5 = vld [vmem:[#allocation5 + $0x54] ss:$36 sps:$4 sm:$0xff]  }
  0x6b   : > { %4662 = vsyncadd (%p5153_p8), [#allocation6], 4294930432  ;;  %1621 = vmatprep.subr.bf16.mxu0 %v4093_v0  ;;  %v4097_v2 = vld [vmem:[#allocation5] ss:$36 sps:$4 sm:$0xff]   ;;  %v4098_v3 = vld [vmem:[#allocation5 + $0x8] ss:$36 sps:$4 sm:$0xff]   ;;  %1703 = vmatprep.subr.bf16.mxu1 %v4095_v1 }
  0x6c   : > { %v4099_v4 = vld [vmem:[#allocation5 + $0x4c] ss:$36 sps:$4 sm:$0xff]   ;;  %1622 = vmatpush1.bf16.msra.mxu0 %v4097_v2  ;;  %1704 = vmatpush1.bf16.msra.mxu1 %v4098_v3  ;;  %v4105_v8 = vld [vmem:[#allocation5 + $0x94] ss:$36 sps:$4 sm:$0xff]   ;;  %v4107_v9 = vld [vmem:[#allocation5 + $0x9c] ss:$36 sps:$4 sm:$0xff]  }
  0x6d   : > { %v4103_v6 = vld [vmem:[#allocation5 + $0x48] ss:$36 sps:$4 sm:$0xff]   ;;  %1623 = vmatprep.subr.bf16.mxu0 %v4099_v4  ;;  %v4104_v7 = vld [vmem:[#allocation5 + $0x50] ss:$36 sps:$4 sm:$0xff]   ;;  %1705 = vmatprep.subr.bf16.mxu1 %v4101_v5  ;;  %v4110_v11 = vld [vmem:[#allocation5 + $0x98] ss:$36 sps:$4 sm:$0xff]  }
  0x6e   : > { %v4109_v10 = vld [vmem:[#allocation5 + $0x90] ss:$36 sps:$4 sm:$0xff]   ;;  %v4111_v12 = vld [vmem:[#allocation5 + $0xdc] ss:$36 sps:$4 sm:$0xff]   ;;  %v4113_v13 = vld [vmem:[#allocation5 + $0xe4] ss:$36 sps:$4 sm:$0xff]  }
  0x6f   : > { %v4115_v14 = vld [vmem:[#allocation5 + $0xd8] ss:$36 sps:$4 sm:$0xff]   ;;  %v4116_v15 = vld [vmem:[#allocation5 + $0xe0] ss:$36 sps:$4 sm:$0xff]   ;;  %v4119_v17 = vld [vmem:[#allocation5 + $0x12c] ss:$36 sps:$4 sm:$0xff]  }
  0x70   : > { %1624 = vmatpush1.bf16.msra.mxu0 %v4103_v6  ;;  %1706 = vmatpush1.bf16.msra.mxu1 %v4104_v7  ;;  %v4117_v16 = vld [vmem:[#allocation5 + $0x124] ss:$36 sps:$4 sm:$0xff]   ;;  %v4123_v20 = vld [vmem:[#allocation5 + $0x16c] ss:$36 sps:$4 sm:$0xff]   ;;  %v4125_v21 = vld [vmem:[#allocation5 + $0x174] ss:$36 sps:$4 sm:$0xff]  }
  0x71   : > { %1625 = vmatprep.subr.bf16.mxu0 %v4105_v8  ;;  %1707 = vmatprep.subr.bf16.mxu1 %v4107_v9  ;;  %v4121_v18 = vld [vmem:[#allocation5 + $0x120] ss:$36 sps:$4 sm:$0xff]   ;;  %v4122_v19 = vld [vmem:[#allocation5 + $0x128] ss:$36 sps:$4 sm:$0xff]   ;;  %v4128_v23 = vld [vmem:[#allocation5 + $0x170] ss:$36 sps:$4 sm:$0xff]  }
  0x72   : > { %v4127_v22 = vld [vmem:[#allocation5 + $0x168] ss:$36 sps:$4 sm:$0xff]   ;;  %v4129_v24 = vld [vmem:[#allocation5 + $0x1b4] ss:$36 sps:$4 sm:$0xff]   ;;  %v4131_v25 = vld [vmem:[#allocation5 + $0x1bc] ss:$36 sps:$4 sm:$0xff]  }
  0x73   : > { %v4133_v26 = vld [vmem:[#allocation5 + $0x1b0] ss:$36 sps:$4 sm:$0xff]   ;;  %v4134_v27 = vld [vmem:[#allocation5 + $0x1b8] ss:$36 sps:$4 sm:$0xff]   ;;  %v4137_v29 = vld [vmem:[#allocation5 + $0x204] ss:$36 sps:$4 sm:$0xff]  }
  0x74   : > { %1626 = vmatpush1.bf16.msra.mxu0 %v4109_v10  ;;  %1708 = vmatpush1.bf16.msra.mxu1 %v4110_v11  ;;  %v4135_v28 = vld [vmem:[#allocation5 + $0x1fc] ss:$36 sps:$4 sm:$0xff]   ;;  %v4141_v32 = vld [vmem:[#allocation5 + $0x244] ss:$36 sps:$4 sm:$0xff]   ;;  %v4143_v33 = vld [vmem:[#allocation5 + $0x24c] ss:$36 sps:$4 sm:$0xff]  }
  0x75   : > { %1627 = vmatprep.subr.bf16.mxu0 %v4111_v12  ;;  %1709 = vmatprep.subr.bf16.mxu1 %v4113_v13  ;;  %v4139_v30 = vld [vmem:[#allocation5 + $0x1f8] ss:$36 sps:$4 sm:$0xff]   ;;  %v4140_v31 = vld [vmem:[#allocation5 + $0x200] ss:$36 sps:$4 sm:$0xff]   ;;  %v4146_v35 = vld [vmem:[#allocation5 + $0x248] ss:$36 sps:$4 sm:$0xff]  }
  0x76   : > { %v4145_v34 = vld [vmem:[#allocation5 + $0x240] ss:$36 sps:$4 sm:$0xff]   ;;  %v4147_v36 = vld [vmem:[#allocation5 + $0x28c] ss:$36 sps:$4 sm:$0xff]   ;;  %v4149_v37 = vld [vmem:[#allocation5 + $0x294] ss:$36 sps:$4 sm:$0xff]  }
  0x77   : > { %v4151_v38 = vld [vmem:[#allocation5 + $0x288] ss:$36 sps:$4 sm:$0xff]   ;;  %v4152_v39 = vld [vmem:[#allocation5 + $0x290] ss:$36 sps:$4 sm:$0xff]   ;;  %v4155_v41 = vld [vmem:[#allocation5 + $0x2dc] ss:$36 sps:$4 sm:$0xff]  }
  0x78   : > { %1628 = vmatpush1.bf16.msra.mxu0 %v4115_v14  ;;  %1710 = vmatpush1.bf16.msra.mxu1 %v4116_v15  ;;  %v4153_v40 = vld [vmem:[#allocation5 + $0x2d4] ss:$36 sps:$4 sm:$0xff]   ;;  %v4159_v44 = vld [vmem:[#allocation5 + $0x31c] ss:$36 sps:$4 sm:$0xff]   ;;  %v4161_v45 = vld [vmem:[#allocation5 + $0x324] ss:$36 sps:$4 sm:$0xff]  }
  0x79   : > { %1629 = vmatprep.subr.bf16.mxu0 %v4117_v16  ;;  %1711 = vmatprep.subr.bf16.mxu1 %v4119_v17  ;;  %v4157_v42 = vld [vmem:[#allocation5 + $0x2d0] ss:$36 sps:$4 sm:$0xff]   ;;  %v4158_v43 = vld [vmem:[#allocation5 + $0x2d8] ss:$36 sps:$4 sm:$0xff]   ;;  %v4164_v49 = vld [vmem:[#allocation5 + $0x320] ss:$36 sps:$4 sm:$0xff]  }
  0x7a   : > { %v272_v46 = vld [vmem:[%s4900_s23 + $0x8] sm:$0xff]  ;;  %v4165_v50 = vld [vmem:[#allocation5 + $0x364] ss:$36 sps:$4 sm:$0xff]   ;;  %v4690_v14 = vmov 0   ;;  %vm4692_vm0 = vmmov 0   ;;  %vm2032_vm1 = vcmask 523264  }
  0x7b   : > { %v4163_v47 = vld [vmem:[#allocation5 + $0x318] ss:$36 sps:$4 sm:$0xff]   ;;  %v4911_v48 = vpack.c.bf16 %v272_v46, %v272_v46  ;;  %v4167_v51 = vld [vmem:[#allocation5 + $0x36c] ss:$36 sps:$4 sm:$0xff]   ;;  %v4169_v52 = vld [vmem:[#allocation5 + $0x360] ss:$36 sps:$4 sm:$0xff]  }
  0x7c   : > { %1630 = vmatpush1.bf16.msra.mxu0 %v4121_v18  ;;  %1712 = vmatpush1.bf16.msra.mxu1 %v4122_v19  ;;  %v4170_v53 = vld [vmem:[#allocation5 + $0x368] ss:$36 sps:$4 sm:$0xff]   ;;  %v4173_v55 = vld [vmem:[#allocation5 + $0x3b4] ss:$36 sps:$4 sm:$0xff]   ;;  %v4179_v59 = vld [vmem:[#allocation5 + $0x3fc] ss:$36 sps:$4 sm:$0xff]  }
  0x7d   : > { %1631 = vmatprep.subr.bf16.mxu0 %v4123_v20  ;;  %1713 = vmatprep.subr.bf16.mxu1 %v4125_v21  ;;  %v4171_v54 = vld [vmem:[#allocation5 + $0x3ac] ss:$36 sps:$4 sm:$0xff]   ;;  %v4177_v58 = vld [vmem:[#allocation5 + $0x3f4] ss:$36 sps:$4 sm:$0xff]   ;;  %v4183_v62 = vld [vmem:[#allocation5 + $0x43c] ss:$36 sps:$4 sm:$0xff]  }
  0x7e   : > { %1653 = vmatprep.mubr.bf16.mxu0 %v4911_v48  ;;  %1735 = vmatprep.mubr.bf16.mxu1 %v4911_v48  ;;  %v4175_v56 = vld [vmem:[#allocation5 + $0x3a8] ss:$36 sps:$4 sm:$0xff]   ;;  %v4176_v57 = vld [vmem:[#allocation5 + $0x3b0] ss:$36 sps:$4 sm:$0xff]   ;;  %v4182_v61 = vld [vmem:[#allocation5 + $0x3f8] ss:$36 sps:$4 sm:$0xff]  }
  0x7f   : > { %v4181_v60 = vld [vmem:[#allocation5 + $0x3f0] ss:$36 sps:$4 sm:$0xff]   ;;  %v4185_v63 = vld [vmem:[#allocation5 + $0x444] ss:$36 sps:$4 sm:$0xff]   ;;  %v4187_v0 = vld [vmem:[#allocation5 + $0x438] ss:$36 sps:$4 sm:$0xff]  }
  0x80   : > { %1632 = vmatpush1.bf16.msra.mxu0 %v4127_v22  ;;  %1714 = vmatpush1.bf16.msra.mxu1 %v4128_v23  ;;  %v4188_v1 = vld [vmem:[#allocation5 + $0x440] ss:$36 sps:$4 sm:$0xff]   ;;  %v271_v2 = vld [vmem:[%s4900_s23] sm:$0xff]  ;;  %v4204_v16 = vld [vmem:[#allocation5 + $0x518] ss:$36 sps:$4 sm:$0xff]   ;;  %s4693_s24 = smov 64  }
  0x81   : > { %1633 = vmatprep.subr.bf16.mxu0 %v4129_v24  ;;  %1715 = vmatprep.subr.bf16.mxu1 %v4131_v25  ;;  %v4191_v3 = vld [vmem:[#allocation5 + $0x484] ss:$36 sps:$4 sm:$0xff]   ;;  %v4194_v4 = vld [vmem:[#allocation5 + $0x48c] ss:$36 sps:$4 sm:$0xff]   ;;  %v4916_v5 = vpack.c.bf16 %v271_v2, %v271_v2  ;;  %v4200_v9 = vld [vmem:[#allocation5 + $0x4d4] ss:$36 sps:$4 sm:$0xff]  }
  0x82   : > { %v4189_v6 = vld [vmem:[#allocation5 + $0x480] ss:$36 sps:$4 sm:$0xff]   ;;  %v4192_v7 = vld [vmem:[#allocation5 + $0x488] ss:$36 sps:$4 sm:$0xff]   ;;  %v4198_v11 = vld [vmem:[#allocation5 + $0x4d0] ss:$36 sps:$4 sm:$0xff]  }
  0x83   : > { %v4197_v8 = vld [vmem:[#allocation5 + $0x4cc] ss:$36 sps:$4 sm:$0xff]   ;;  %v4203_v12 = vld [vmem:[#allocation5 + $0x514] ss:$36 sps:$4 sm:$0xff]   ;;  %v4206_v13 = vld [vmem:[#allocation5 + $0x51c] ss:$36 sps:$4 sm:$0xff]  }
  0x84   : > { %1634 = vmatpush1.bf16.msra.mxu0 %v4133_v26  ;;  %1716 = vmatpush1.bf16.msra.mxu1 %v4134_v27  ;;  %v4195_v10 = vld [vmem:[#allocation5 + $0x4c8] ss:$36 sps:$4 sm:$0xff]   ;;  %v4201_v15 = vld [vmem:[#allocation5 + $0x510] ss:$36 sps:$4 sm:$0xff]   ;;  %v4209_v17 = vld [vmem:[#allocation5 + $0x55c] ss:$36 sps:$4 sm:$0xff]  }
  0x85   : > { %1635 = vmatprep.subr.bf16.mxu0 %v4135_v28  ;;  %1717 = vmatprep.subr.bf16.mxu1 %v4137_v29  ;;  %v4212_v18 = vld [vmem:[#allocation5 + $0x564] ss:$36 sps:$4 sm:$0xff]   ;;  %v4207_v19 = vld [vmem:[#allocation5 + $0x558] ss:$36 sps:$4 sm:$0xff]   ;;  %v4218_v22 = vld [vmem:[#allocation5 + $0x5ac] ss:$36 sps:$4 sm:$0xff]  }
  0x86   : > { %v4210_v20 = vld [vmem:[#allocation5 + $0x560] ss:$36 sps:$4 sm:$0xff]   ;;  %v4216_v24 = vld [vmem:[#allocation5 + $0x5a8] ss:$36 sps:$4 sm:$0xff]   ;;  %v4224_v26 = vld [vmem:[#allocation5 + $0x5f4] ss:$36 sps:$4 sm:$0xff]  }
  0x87   : > { %v4215_v21 = vld [vmem:[#allocation5 + $0x5a4] ss:$36 sps:$4 sm:$0xff]   ;;  %v4221_v25 = vld [vmem:[#allocation5 + $0x5ec] ss:$36 sps:$4 sm:$0xff]   ;;  %v4227_v29 = vld [vmem:[#allocation5 + $0x634] ss:$36 sps:$4 sm:$0xff]  }
  0x88   : > { %1636 = vmatpush1.bf16.msra.mxu0 %v4139_v30  ;;  %1718 = vmatpush1.bf16.msra.mxu1 %v4140_v31  ;;  %v4213_v23 = vld [vmem:[#allocation5 + $0x5a0] ss:$36 sps:$4 sm:$0xff]   ;;  %v4219_v27 = vld [vmem:[#allocation5 + $0x5e8] ss:$36 sps:$4 sm:$0xff]   ;;  %v4222_v28 = vld [vmem:[#allocation5 + $0x5f0] ss:$36 sps:$4 sm:$0xff]  }
  0x89   : > { %1637 = vmatprep.subr.bf16.mxu0 %v4141_v32  ;;  %1719 = vmatprep.subr.bf16.mxu1 %v4143_v33  ;;  %v4230_v30 = vld [vmem:[#allocation5 + $0x63c] ss:$36 sps:$4 sm:$0xff]   ;;  %v4225_v31 = vld [vmem:[#allocation5 + $0x630] ss:$36 sps:$4 sm:$0xff]   ;;  %v4245_v46 = vld [vmem:[#allocation5 + $0xa4] ss:$36 sps:$4 sm:$0xff]  }
  0x8a   : > { %v4228_v32 = vld [vmem:[#allocation5 + $0x638] ss:$36 sps:$4 sm:$0xff]   ;;  %v4255_v2 = vld [vmem:[#allocation5 + $0x1c0] ss:$36 sps:$4 sm:$0xff]   ;;  %vm2096_vm2 = vcmask 1043456   ;;  %vm2079_vm3 = vcmask 64512  }
  0x8b   : > { %v4233_v33 = vld [vmem:[#allocation5 + $0x67c] ss:$36 sps:$4 sm:$0xff]   ;;  %s4012_s13 = smul.u32 384, %s4746_s22  ;;  %s269_s6 = scalar_lea.vmem [#allocation8], %s4011_s15 }
  0x8c   : > { %1638 = vmatpush1.bf16.msra.mxu0 %v4145_v34  ;;  %1720 = vmatpush1.bf16.msra.mxu1 %v4146_v35  ;;  %v4236_v34 = vld [vmem:[#allocation5 + $0x684] ss:$36 sps:$4 sm:$0xff]   ;;  %v4231_v35 = vld [vmem:[#allocation5 + $0x678] ss:$36 sps:$4 sm:$0xff]   ;;  %s3388_s9 = sshll.u32 %s269_s6, 4  ;;  %s3374_s22 = scalar_lea.sflag [#allocation4], %s4894_s14  ;;  %s5093_s9 = int_to_ptr.vmem [resolvable:$true] %s3388_s9 }
  0x8d   : > { %1639 = vmatprep.subr.bf16.mxu0 %v4147_v36  ;;  %1721 = vmatprep.subr.bf16.mxu1 %v4149_v37  ;;  %v4234_v36 = vld [vmem:[#allocation5 + $0x680] ss:$36 sps:$4 sm:$0xff]   ;;  %s5091_s10 = scalar_lea.hbm %s5140_s5, %s4012_s13  ;;  %s4611_s28 = scalar_lea.vmem %s5093_s9, 384 }
  0x8e   : > { %v273_v37 = vld [vmem:[%s4900_s23 + $0x10] sm:$0xff]  ;;  %p4612_p11 = scmp.ne.s32.totalorder %s5093_s9, %s4611_s28  ;;  %p5154_p0 = scmp.ne.s32.totalorder %s5149_s30, 0 }
  0x8f   : > { %s4694_s15 = smov [#allocation8]  }
  0x90   : > { %1640 = vmatpush1.bf16.msra.mxu0 %v4151_v38  ;;  %1722 = vmatpush1.bf16.msra.mxu1 %v4152_v39  ;;  %v4239_v38 = vld [vmem:[#allocation5 + $0x14] ss:$36 sps:$4 sm:$0xff]   ;;  %v4278_v39 = vld [vmem:[#allocation5 + $0x1c] ss:$36 sps:$4 sm:$0xff]   ;;  %p4613_p1 = pnand %p4612_p11, %p5154_p0  ;;  %s4615_s17 = sshll.u32 %s4694_s15, 4  ;;  %s4616_s17 = int_to_ptr.vmem [resolvable:$false] %s4615_s17 }
  0x91   : > { %1641 = vmatprep.subr.bf16.mxu0 %v4153_v40  ;;  %1723 = vmatprep.subr.bf16.mxu1 %v4155_v41  ;;  %v4923_v40 = vpack.c.bf16 %v273_v37, %v273_v37  ;;  %v4237_v41 = vld [vmem:[#allocation5 + $0x10] ss:$36 sps:$4 sm:$0xff]   ;;  %s4617_s23 = scalar_lea.vmem %s4616_s17, 768  ;;  %p4618_p5 = scmp.lt.s32.totalorder %s5093_s9, %s4616_s17 }
  0x92   : > { %v4293_v37 = vld [vmem:[#allocation5 + $0x44c] ss:$36 sps:$4 sm:$0xff]   ;;  %p4614_p3 = pneg %p4613_p1  ;;  %p4619_p9 = scmp.lt.s32.totalorder %s4617_s23, %s4611_s28 }
  0x94   : > { %1642 = vmatpush1.bf16.msra.mxu0 %v4157_v42  ;;  %1724 = vmatpush1.bf16.msra.mxu1 %v4158_v43  ;;  %v4242_v42 = vld [vmem:[#allocation5 + $0x5c] ss:$36 sps:$4 sm:$0xff]   ;;  %p4620_p12 = por %p4619_p9, %p4618_p5 }
  0x95   : > { %1643 = vmatprep.subr.bf16.mxu0 %v4159_v44  ;;  %1725 = vmatprep.subr.bf16.mxu1 %v4161_v45  ;;  %v4276_v43 = vld [vmem:[#allocation5 + $0x18] ss:$36 sps:$4 sm:$0xff]   ;;  %v4284_v44 = vld [vmem:[#allocation5 + $0x64] ss:$36 sps:$4 sm:$0xff]  }
  0x96   : > { %v4240_v45 = vld [vmem:[#allocation5 + $0x58] ss:$36 sps:$4 sm:$0xff]   ;;  %p4621_p2 = pnand %p4620_p12, %p4614_p3 }
  0x98   : > { %1644 = vmatpush1.bf16.msra.mxu0 %v4163_v47  ;;  %1726 = vmatpush1.bf16.msra.mxu1 %v4164_v49  ;;  %v4282_v47 = vld [vmem:[#allocation5 + $0x60] ss:$36 sps:$4 sm:$0xff]   ;;  %v4290_v49 = vld [vmem:[#allocation5 + $0xac] ss:$36 sps:$4 sm:$0xff]  }
  0x99   : > { %1645 = vmatprep.subr.bf16.mxu0 %v4165_v50  ;;  %1727 = vmatprep.subr.bf16.mxu1 %v4167_v51  ;;  %v4243_v50 = vld [vmem:[#allocation5 + $0xa0] ss:$36 sps:$4 sm:$0xff]   ;;  %v4248_v51 = vld [vmem:[#allocation5 + $0xec] ss:$36 sps:$4 sm:$0xff]  }
  0x9c   : > { %1646 = vmatpush1.bf16.msra.mxu0 %v4169_v52  ;;  %1728 = vmatpush1.bf16.msra.mxu1 %v4170_v53  ;;  %v4288_v52 = vld [vmem:[#allocation5 + $0xa8] ss:$36 sps:$4 sm:$0xff]   ;;  %v4296_v53 = vld [vmem:[#allocation5 + $0xf4] ss:$36 sps:$4 sm:$0xff]  }
  0x9d   : > { %1647 = vmatprep.subr.bf16.mxu0 %v4171_v54  ;;  %1729 = vmatprep.subr.bf16.mxu1 %v4173_v55  ;;  %v4246_v54 = vld [vmem:[#allocation5 + $0xe8] ss:$36 sps:$4 sm:$0xff]   ;;  %v4251_v55 = vld [vmem:[#allocation5 + $0x134] ss:$36 sps:$4 sm:$0xff]  }
  0xa0   : > { %1648 = vmatpush1.bf16.msra.mxu0 %v4175_v56  ;;  %1730 = vmatpush1.bf16.msra.mxu1 %v4176_v57  ;;  %v4294_v56 = vld [vmem:[#allocation5 + $0xf0] ss:$36 sps:$4 sm:$0xff]   ;;  %v4302_v57 = vld [vmem:[#allocation5 + $0x13c] ss:$36 sps:$4 sm:$0xff]  }
  0xa1   : > { %1649 = vmatprep.subr.bf16.mxu0 %v4177_v58  ;;  %1731 = vmatprep.subr.bf16.mxu1 %v4179_v59  ;;  %v4249_v58 = vld [vmem:[#allocation5 + $0x130] ss:$36 sps:$4 sm:$0xff]   ;;  %v4254_v59 = vld [vmem:[#allocation5 + $0x17c] ss:$36 sps:$4 sm:$0xff]  }
  0xa4   : > { %1650 = vmatpush1.bf16.msra.mxu0 %v4181_v60  ;;  %1732 = vmatpush1.bf16.msra.mxu1 %v4182_v61  ;;  %v4300_v60 = vld [vmem:[#allocation5 + $0x138] ss:$36 sps:$4 sm:$0xff]   ;;  %v4308_v61 = vld [vmem:[#allocation5 + $0x184] ss:$36 sps:$4 sm:$0xff]  }
  0xa5   : > { %1651 = vmatprep.subr.bf16.mxu0 %v4183_v62  ;;  %1733 = vmatprep.subr.bf16.mxu1 %v4185_v63  ;;  %v4252_v62 = vld [vmem:[#allocation5 + $0x178] ss:$36 sps:$4 sm:$0xff]   ;;  %v4257_v63 = vld [vmem:[#allocation5 + $0x1c4] ss:$36 sps:$4 sm:$0xff]  }
  0xa8   : > { %1652 = vmatpush1.bf16.msra.mxu0 %v4187_v0  ;;  %1734 = vmatpush1.bf16.msra.mxu1 %v4188_v1  ;;  %v4306_v0 = vld [vmem:[#allocation5 + $0x180] ss:$36 sps:$4 sm:$0xff]   ;;  %v4314_v1 = vld [vmem:[#allocation5 + $0x1cc] ss:$36 sps:$4 sm:$0xff]  }
  0xa9   : > { %1662 = vmatprep.subr.bf16.mxu0 %v4191_v3  ;;  %1744 = vmatprep.subr.bf16.mxu1 %v4194_v4  ;;  %v4260_v3 = vld [vmem:[#allocation5 + $0x20c] ss:$36 sps:$4 sm:$0xff]  }
  0xaa   : > { %v4312_v4 = vld [vmem:[#allocation5 + $0x1c8] ss:$36 sps:$4 sm:$0xff]  }
  0xab   : > { %1654 = vmatmul.mubr.bf16.vlgmr.msra.gmra.mrb[0].mxu0 %v4916_v5  ;;  %1736 = vmatmul.mubr.bf16.vlgmr.msra.gmra.mrb[0].mxu1 %v4916_v5 }
  0xac   : > { %1663 = vmatpush1.bf16.msra.mxu0 %v4189_v6  ;;  %1745 = vmatpush1.bf16.msra.mxu1 %v4192_v7  ;;  %v4320_v6 = vld [vmem:[#allocation5 + $0x214] ss:$36 sps:$4 sm:$0xff]   ;;  %v4258_v7 = vld [vmem:[#allocation5 + $0x208] ss:$36 sps:$4 sm:$0xff]  }
  0xad   : > { %1664 = vmatprep.subr.bf16.mxu0 %v4197_v8  ;;  %1746 = vmatprep.subr.bf16.mxu1 %v4200_v9  ;;  %v4263_v8 = vld [vmem:[#allocation5 + $0x254] ss:$36 sps:$4 sm:$0xff]  }
  0xae   : > { %1694 = vmatprep.mubr.bf16.mxu0 %v4690_v14  ;;  %1776 = vmatprep.mubr.bf16.mxu1 %v4690_v14  ;;  %v4318_v9 = vld [vmem:[#allocation5 + $0x210] ss:$36 sps:$4 sm:$0xff]  }
  0xb0   : > { %1665 = vmatpush1.bf16.msra.mxu0 %v4195_v10  ;;  %1747 = vmatpush1.bf16.msra.mxu1 %v4198_v11  ;;  %v4326_v10 = vld [vmem:[#allocation5 + $0x25c] ss:$36 sps:$4 sm:$0xff]   ;;  %v4261_v11 = vld [vmem:[#allocation5 + $0x250] ss:$36 sps:$4 sm:$0xff]  }
  0xb1   : > { %1666 = vmatprep.subr.bf16.mxu0 %v4203_v12  ;;  %1748 = vmatprep.subr.bf16.mxu1 %v4206_v13  ;;  %v4266_v12 = vld [vmem:[#allocation5 + $0x29c] ss:$36 sps:$4 sm:$0xff]  }
  0xb2   : > { %v4324_v13 = vld [vmem:[#allocation5 + $0x258] ss:$36 sps:$4 sm:$0xff]  }
  0xb4   : > { %1667 = vmatpush1.bf16.msra.mxu0 %v4201_v15  ;;  %1749 = vmatpush1.bf16.msra.mxu1 %v4204_v16  ;;  %v4332_v15 = vld [vmem:[#allocation5 + $0x2a4] ss:$36 sps:$4 sm:$0xff]   ;;  %v4264_v16 = vld [vmem:[#allocation5 + $0x298] ss:$36 sps:$4 sm:$0xff]  }
  0xb5   : > { %1668 = vmatprep.subr.bf16.mxu0 %v4209_v17  ;;  %1750 = vmatprep.subr.bf16.mxu1 %v4212_v18  ;;  %v4269_v17 = vld [vmem:[#allocation5 + $0x2e4] ss:$36 sps:$4 sm:$0xff]  }
  0xb6   : > { %v4330_v18 = vld [vmem:[#allocation5 + $0x2a0] ss:$36 sps:$4 sm:$0xff]  }
  0xb8   : > { %1669 = vmatpush1.bf16.msra.mxu0 %v4207_v19  ;;  %1751 = vmatpush1.bf16.msra.mxu1 %v4210_v20  ;;  %v4338_v19 = vld [vmem:[#allocation5 + $0x2ec] ss:$36 sps:$4 sm:$0xff]   ;;  %v4267_v20 = vld [vmem:[#allocation5 + $0x2e0] ss:$36 sps:$4 sm:$0xff]  }
  0xb9   : > { %1670 = vmatprep.subr.bf16.mxu0 %v4215_v21  ;;  %1752 = vmatprep.subr.bf16.mxu1 %v4218_v22  ;;  %v4272_v21 = vld [vmem:[#allocation5 + $0x32c] ss:$36 sps:$4 sm:$0xff]  }
  0xba   : > { %v4336_v22 = vld [vmem:[#allocation5 + $0x2e8] ss:$36 sps:$4 sm:$0xff]  }
  0xbc   : > { %1671 = vmatpush1.bf16.msra.mxu0 %v4213_v23  ;;  %1753 = vmatpush1.bf16.msra.mxu1 %v4216_v24  ;;  %v4344_v23 = vld [vmem:[#allocation5 + $0x334] ss:$36 sps:$4 sm:$0xff]   ;;  %v4270_v24 = vld [vmem:[#allocation5 + $0x328] ss:$36 sps:$4 sm:$0xff]  }
  0xbd   : > { %1672 = vmatprep.subr.bf16.mxu0 %v4221_v25  ;;  %1754 = vmatprep.subr.bf16.mxu1 %v4224_v26  ;;  %v4275_v25 = vld [vmem:[#allocation5 + $0x374] ss:$36 sps:$4 sm:$0xff]  }
  0xbe   : > { %v4342_v26 = vld [vmem:[#allocation5 + $0x330] ss:$36 sps:$4 sm:$0xff]  }
  0xc0   : > { %1673 = vmatpush1.bf16.msra.mxu0 %v4219_v27  ;;  %1755 = vmatpush1.bf16.msra.mxu1 %v4222_v28  ;;  %v4347_v27 = vld [vmem:[#allocation5 + $0x37c] ss:$36 sps:$4 sm:$0xff]   ;;  %v4273_v28 = vld [vmem:[#allocation5 + $0x370] ss:$36 sps:$4 sm:$0xff]  }
  0xc1   : > { %1674 = vmatprep.subr.bf16.mxu0 %v4227_v29  ;;  %1756 = vmatprep.subr.bf16.mxu1 %v4230_v30  ;;  %v4281_v29 = vld [vmem:[#allocation5 + $0x3bc] ss:$36 sps:$4 sm:$0xff]  }
  0xc2   : > { %v4345_v30 = vld [vmem:[#allocation5 + $0x378] ss:$36 sps:$4 sm:$0xff]  }
  0xc4   : > { %1675 = vmatpush1.bf16.msra.mxu0 %v4225_v31  ;;  %1757 = vmatpush1.bf16.msra.mxu1 %v4228_v32  ;;  %v4350_v31 = vld [vmem:[#allocation5 + $0x3c4] ss:$36 sps:$4 sm:$0xff]   ;;  %v4279_v32 = vld [vmem:[#allocation5 + $0x3b8] ss:$36 sps:$4 sm:$0xff]  }
  0xc5   : > { %1676 = vmatprep.subr.bf16.mxu0 %v4233_v33  ;;  %1758 = vmatprep.subr.bf16.mxu1 %v4236_v34  ;;  %v4287_v33 = vld [vmem:[#allocation5 + $0x404] ss:$36 sps:$4 sm:$0xff]  }
  0xc6   : > { %v4348_v34 = vld [vmem:[#allocation5 + $0x3c0] ss:$36 sps:$4 sm:$0xff]  }
  0xc8   : > { %1677 = vmatpush1.bf16.msra.mxu0 %v4231_v35  ;;  %1759 = vmatpush1.bf16.msra.mxu1 %v4234_v36  ;;  %v4353_v35 = vld [vmem:[#allocation5 + $0x40c] ss:$36 sps:$4 sm:$0xff]   ;;  %v4285_v36 = vld [vmem:[#allocation5 + $0x400] ss:$36 sps:$4 sm:$0xff]  }
  0xc9   : > { %1785 = vmatprep.subr.bf16.mxu0 %v4239_v38  ;;  %1867 = vmatprep.subr.bf16.mxu1 %v4278_v39  ;;  %v4351_v38 = vld [vmem:[#allocation5 + $0x408] ss:$36 sps:$4 sm:$0xff]   ;;  %v4356_v39 = vld [vmem:[#allocation5 + $0x454] ss:$36 sps:$4 sm:$0xff]  }
  0xcb   : > { %1695 = vmatmul.mubr.bf16.vlgmr.msra.gmra.mrb[0].mxu0 %v4923_v40  ;;  %1777 = vmatmul.mubr.bf16.vlgmr.msra.gmra.mrb[0].mxu1 %v4923_v40 }
  0xcc   : > { %1786 = vmatpush1.bf16.msra.mxu0 %v4237_v41  ;;  %1868 = vmatpush1.bf16.msra.mxu1 %v4276_v43  ;;  %v4291_v41 = vld [vmem:[#allocation5 + $0x448] ss:$36 sps:$4 sm:$0xff]   ;;  %v4299_v43 = vld [vmem:[#allocation5 + $0x494] ss:$36 sps:$4 sm:$0xff]  }
  0xcd   : > { %1787 = vmatprep.subr.bf16.mxu0 %v4242_v42  ;;  %1869 = vmatprep.subr.bf16.mxu1 %v4284_v44  ;;  %v4354_v42 = vld [vmem:[#allocation5 + $0x450] ss:$36 sps:$4 sm:$0xff]   ;;  %v4359_v44 = vld [vmem:[#allocation5 + $0x49c] ss:$36 sps:$4 sm:$0xff]  }
  0xce   : > { %1817 = vmatprep.mubr.bf16.mxu0 %v4911_v48  ;;  %1899 = vmatprep.mubr.bf16.mxu1 %v4911_v48 }
  0xd0   : > { %1788 = vmatpush1.bf16.msra.mxu0 %v4240_v45  ;;  %1870 = vmatpush1.bf16.msra.mxu1 %v4282_v47  ;;  %v4297_v45 = vld [vmem:[#allocation5 + $0x490] ss:$36 sps:$4 sm:$0xff]   ;;  %v4357_v47 = vld [vmem:[#allocation5 + $0x498] ss:$36 sps:$4 sm:$0xff]  }
  0xd1   : > { %1789 = vmatprep.subr.bf16.mxu0 %v4245_v46  ;;  %1871 = vmatprep.subr.bf16.mxu1 %v4290_v49  ;;  %v4305_v46 = vld [vmem:[#allocation5 + $0x4dc] ss:$36 sps:$4 sm:$0xff]   ;;  %v4362_v49 = vld [vmem:[#allocation5 + $0x4e4] ss:$36 sps:$4 sm:$0xff]  }
  0xd4   : > { %1790 = vmatpush1.bf16.msra.mxu0 %v4243_v50  ;;  %1872 = vmatpush1.bf16.msra.mxu1 %v4288_v52  ;;  %v4303_v50 = vld [vmem:[#allocation5 + $0x4d8] ss:$36 sps:$4 sm:$0xff]   ;;  %v4360_v52 = vld [vmem:[#allocation5 + $0x4e0] ss:$36 sps:$4 sm:$0xff]  }
  0xd5   : > { %1791 = vmatprep.subr.bf16.mxu0 %v4248_v51  ;;  %1873 = vmatprep.subr.bf16.mxu1 %v4296_v53  ;;  %v4311_v51 = vld [vmem:[#allocation5 + $0x524] ss:$36 sps:$4 sm:$0xff]   ;;  %v4365_v53 = vld [vmem:[#allocation5 + $0x52c] ss:$36 sps:$4 sm:$0xff]  }
  0xd8   : > { %1792 = vmatpush1.bf16.msra.mxu0 %v4246_v54  ;;  %1874 = vmatpush1.bf16.msra.mxu1 %v4294_v56  ;;  %v4309_v54 = vld [vmem:[#allocation5 + $0x520] ss:$36 sps:$4 sm:$0xff]   ;;  %v4363_v56 = vld [vmem:[#allocation5 + $0x528] ss:$36 sps:$4 sm:$0xff]  }
  0xd9   : > { %1793 = vmatprep.subr.bf16.mxu0 %v4251_v55  ;;  %1875 = vmatprep.subr.bf16.mxu1 %v4302_v57  ;;  %v4317_v55 = vld [vmem:[#allocation5 + $0x56c] ss:$36 sps:$4 sm:$0xff]   ;;  %v4368_v57 = vld [vmem:[#allocation5 + $0x574] ss:$36 sps:$4 sm:$0xff]  }
  0xdc   : > { %1794 = vmatpush1.bf16.msra.mxu0 %v4249_v58  ;;  %1876 = vmatpush1.bf16.msra.mxu1 %v4300_v60  ;;  %v4315_v58 = vld [vmem:[#allocation5 + $0x568] ss:$36 sps:$4 sm:$0xff]   ;;  %v4366_v60 = vld [vmem:[#allocation5 + $0x570] ss:$36 sps:$4 sm:$0xff]  }
  0xdd   : > { %1795 = vmatprep.subr.bf16.mxu0 %v4254_v59  ;;  %1877 = vmatprep.subr.bf16.mxu1 %v4308_v61  ;;  %v4323_v59 = vld [vmem:[#allocation5 + $0x5b4] ss:$36 sps:$4 sm:$0xff]   ;;  %v4371_v61 = vld [vmem:[#allocation5 + $0x5bc] ss:$36 sps:$4 sm:$0xff]  }
  0xe0   : > { %1796 = vmatpush1.bf16.msra.mxu0 %v4252_v62  ;;  %1878 = vmatpush1.bf16.msra.mxu1 %v4306_v0  ;;  %v4321_v62 = vld [vmem:[#allocation5 + $0x5b0] ss:$36 sps:$4 sm:$0xff]   ;;  %v4369_v0 = vld [vmem:[#allocation5 + $0x5b8] ss:$36 sps:$4 sm:$0xff]  }
  0xe1   : > { %1797 = vmatprep.subr.bf16.mxu0 %v4257_v63  ;;  %1879 = vmatprep.subr.bf16.mxu1 %v4314_v1  ;;  %v4329_v63 = vld [vmem:[#allocation5 + $0x5fc] ss:$36 sps:$4 sm:$0xff]   ;;  %v4374_v1 = vld [vmem:[#allocation5 + $0x604] ss:$36 sps:$4 sm:$0xff]  }
  0xe4   : > { %1798 = vmatpush1.bf16.msra.mxu0 %v4255_v2  ;;  %1880 = vmatpush1.bf16.msra.mxu1 %v4312_v4  ;;  %v4327_v2 = vld [vmem:[#allocation5 + $0x5f8] ss:$36 sps:$4 sm:$0xff]   ;;  %v4372_v4 = vld [vmem:[#allocation5 + $0x600] ss:$36 sps:$4 sm:$0xff]  }
  0xe5   : > { %1799 = vmatprep.subr.bf16.mxu0 %v4260_v3  ;;  %1881 = vmatprep.subr.bf16.mxu1 %v4320_v6  ;;  %v4335_v3 = vld [vmem:[#allocation5 + $0x644] ss:$36 sps:$4 sm:$0xff]   ;;  %v4377_v6 = vld [vmem:[#allocation5 + $0x64c] ss:$36 sps:$4 sm:$0xff]  }
  0xe8   : > { %1800 = vmatpush1.bf16.msra.mxu0 %v4258_v7  ;;  %1882 = vmatpush1.bf16.msra.mxu1 %v4318_v9  ;;  %v4333_v7 = vld [vmem:[#allocation5 + $0x640] ss:$36 sps:$4 sm:$0xff]   ;;  %v4375_v9 = vld [vmem:[#allocation5 + $0x648] ss:$36 sps:$4 sm:$0xff]  }
  0xe9   : > { %1801 = vmatprep.subr.bf16.mxu0 %v4263_v8  ;;  %1883 = vmatprep.subr.bf16.mxu1 %v4326_v10  ;;  %v4341_v8 = vld [vmem:[#allocation5 + $0x68c] ss:$36 sps:$4 sm:$0xff]   ;;  %v4380_v10 = vld [vmem:[#allocation5 + $0x694] ss:$36 sps:$4 sm:$0xff]  }
  0xec   : > { %1802 = vmatpush1.bf16.msra.mxu0 %v4261_v11  ;;  %1884 = vmatpush1.bf16.msra.mxu1 %v4324_v13  ;;  %v4339_v11 = vld [vmem:[#allocation5 + $0x688] ss:$36 sps:$4 sm:$0xff]   ;;  %v4382_v13 = vld [vmem:[#allocation5 + $0x260] ss:$36 sps:$4 sm:$0xff]  }
  0xed   : > { %1803 = vmatprep.subr.bf16.mxu0 %v4266_v12  ;;  %1885 = vmatprep.subr.bf16.mxu1 %v4332_v15  ;;  %v4378_v12 = vld [vmem:[#allocation5 + $0x690] ss:$36 sps:$4 sm:$0xff]   ;;  %v4383_v15 = vld [vmem:[#allocation5 + $0x20] ss:$36 sps:$4 sm:$0xff]  }
  0xf0   : > { %1804 = vmatpush1.bf16.msra.mxu0 %v4264_v16  ;;  %1886 = vmatpush1.bf16.msra.mxu1 %v4330_v18  ;;  %v4381_v16 = vld [vmem:[#allocation5 + $0x4a0] ss:$36 sps:$4 sm:$0xff]   ;;  %v4691_v18 = vmov 0.0  }
  0xf1   : > { %1805 = vmatprep.subr.bf16.mxu0 %v4269_v17  ;;  %1887 = vmatprep.subr.bf16.mxu1 %v4338_v19  ;;  %v4385_v17 = vld [vmem:[#allocation5 + $0x2a8] ss:$36 sps:$4 sm:$0xff]  }
  0xf2   : > { %v4386_v19 = vld [vmem:[#allocation5 + $0x68] ss:$36 sps:$4 sm:$0xff]  }
  0xf4   : > { %1806 = vmatpush1.bf16.msra.mxu0 %v4267_v20  ;;  %1888 = vmatpush1.bf16.msra.mxu1 %v4336_v22  ;;  %v4384_v20 = vld [vmem:[#allocation5 + $0x4e8] ss:$36 sps:$4 sm:$0xff]   ;;  %v4389_v22 = vld [vmem:[#allocation5 + $0xb0] ss:$36 sps:$4 sm:$0xff]  }
  0xf5   : > { %1807 = vmatprep.subr.bf16.mxu0 %v4272_v21  ;;  %1889 = vmatprep.subr.bf16.mxu1 %v4344_v23  ;;  %v4388_v21 = vld [vmem:[#allocation5 + $0x2f0] ss:$36 sps:$4 sm:$0xff]  }
  0xf6   : > { %v4387_v23 = vld [vmem:[#allocation5 + $0x530] ss:$36 sps:$4 sm:$0xff]  }
  0xf8   : > { %1808 = vmatpush1.bf16.msra.mxu0 %v4270_v24  ;;  %1890 = vmatpush1.bf16.msra.mxu1 %v4342_v26  ;;  %v4391_v24 = vld [vmem:[#allocation5 + $0x338] ss:$36 sps:$4 sm:$0xff]  }
  0xf9   : > { %1809 = vmatprep.subr.bf16.mxu0 %v4275_v25  ;;  %1891 = vmatprep.subr.bf16.mxu1 %v4347_v27  ;;  %v4392_v25 = vld [vmem:[#allocation5 + $0xf8] ss:$36 sps:$4 sm:$0xff]   ;;  %v4394_v27 = vld [vmem:[#allocation5 + $0x380] ss:$36 sps:$4 sm:$0xff]  }
  0xfa   : > { %v4390_v26 = vld [vmem:[#allocation5 + $0x578] ss:$36 sps:$4 sm:$0xff]  }
  0xfc   : > { %1810 = vmatpush1.bf16.msra.mxu0 %v4273_v28  ;;  %1892 = vmatpush1.bf16.msra.mxu1 %v4345_v30  ;;  %v4393_v28 = vld [vmem:[#allocation5 + $0x5c0] ss:$36 sps:$4 sm:$0xff]   ;;  %v4398_v30 = vld [vmem:[#allocation5 + $0x188] ss:$36 sps:$4 sm:$0xff]  }
  0xfd   : > { %1811 = vmatprep.subr.bf16.mxu0 %v4281_v29  ;;  %1893 = vmatprep.subr.bf16.mxu1 %v4350_v31  ;;  %v4397_v29 = vld [vmem:[#allocation5 + $0x3c8] ss:$36 sps:$4 sm:$0xff]  }
  0xfe   : > { %v4396_v31 = vld [vmem:[#allocation5 + $0x608] ss:$36 sps:$4 sm:$0xff]  }
 0x100   : > { %1812 = vmatpush1.bf16.msra.mxu0 %v4279_v32  ;;  %1894 = vmatpush1.bf16.msra.mxu1 %v4348_v34  ;;  %v4400_v32 = vld [vmem:[#allocation5 + $0x410] ss:$36 sps:$4 sm:$0xff]  }
 0x101   : > { %1813 = vmatprep.subr.bf16.mxu0 %v4287_v33  ;;  %1895 = vmatprep.subr.bf16.mxu1 %v4353_v35  ;;  %v4401_v33 = vld [vmem:[#allocation5 + $0x1d0] ss:$36 sps:$4 sm:$0xff]   ;;  %v4403_v35 = vld [vmem:[#allocation5 + $0x458] ss:$36 sps:$4 sm:$0xff]  }
 0x102   : > { %v4399_v34 = vld [vmem:[#allocation5 + $0x650] ss:$36 sps:$4 sm:$0xff]  }
 0x104   : > { %1814 = vmatpush1.bf16.msra.mxu0 %v4285_v36  ;;  %1896 = vmatpush1.bf16.msra.mxu1 %v4351_v38  ;;  %v4404_v36 = vld [vmem:[#allocation5 + $0x218] ss:$36 sps:$4 sm:$0xff]  }
 0x105   : > { %1815 = vmatprep.subr.bf16.mxu0 %v4293_v37  ;;  %1897 = vmatprep.subr.bf16.mxu1 %v4356_v39  ;;  %v4402_v37 = vld [vmem:[#allocation5 + $0x698] ss:$36 sps:$4 sm:$0xff]  }
 0x108   : > { %1816 = vmatpush1.bf16.msra.mxu0 %v4291_v41  ;;  %1898 = vmatpush1.bf16.msra.mxu1 %v4354_v42 }
 0x109   : > { %1826 = vmatprep.subr.bf16.mxu0 %v4299_v43  ;;  %1908 = vmatprep.subr.bf16.mxu1 %v4359_v44 }
 0x10b   : > { %1818 = vmatmul.mubr.bf16.vlgmr.msra.gmra.mrb[4].mxu0 %v4916_v5  ;;  %1900 = vmatmul.mubr.bf16.vlgmr.msra.gmra.mrb[4].mxu1 %v4916_v5 }
 0x10c   : > { %1827 = vmatpush1.bf16.msra.mxu0 %v4297_v45  ;;  %1858 = vmatprep.mubr.bf16.mxu0 %v4690_v14 }
 0x10d   : > { %1828 = vmatprep.subr.bf16.mxu0 %v4305_v46  ;;  %1909 = vmatpush1.bf16.msra.mxu1 %v4357_v47 }
 0x10e   : > { %1910 = vmatprep.subr.bf16.mxu1 %v4362_v49  ;;  %1940 = vmatprep.mubr.bf16.mxu1 %v4690_v14 }
 0x110   : > { %1829 = vmatpush1.bf16.msra.mxu0 %v4303_v50 }
 0x111   : > { %1830 = vmatprep.subr.bf16.mxu0 %v4311_v51  ;;  %1911 = vmatpush1.bf16.msra.mxu1 %v4360_v52 }
 0x112   : > { %1912 = vmatprep.subr.bf16.mxu1 %v4365_v53 }
 0x114   : > { %1831 = vmatpush1.bf16.msra.mxu0 %v4309_v54 }
 0x115   : > { %1832 = vmatprep.subr.bf16.mxu0 %v4317_v55  ;;  %1913 = vmatpush1.bf16.msra.mxu1 %v4363_v56 }
 0x116   : > { %1914 = vmatprep.subr.bf16.mxu1 %v4368_v57 }
 0x118   : > { %1833 = vmatpush1.bf16.msra.mxu0 %v4315_v58 }
 0x119   : > { %1834 = vmatprep.subr.bf16.mxu0 %v4323_v59  ;;  %1915 = vmatpush1.bf16.msra.mxu1 %v4366_v60 }
 0x11a   : > { %1916 = vmatprep.subr.bf16.mxu1 %v4371_v61 }
 0x11c   : > { %1835 = vmatpush1.bf16.msra.mxu0 %v4321_v62 }
 0x11d   : > { %1836 = vmatprep.subr.bf16.mxu0 %v4329_v63  ;;  %1917 = vmatpush1.bf16.msra.mxu1 %v4369_v0 }
 0x11e   : > { %1918 = vmatprep.subr.bf16.mxu1 %v4374_v1 }
 0x120   : > { %1837 = vmatpush1.bf16.msra.mxu0 %v4327_v2 }
 0x121   : > { %1838 = vmatprep.subr.bf16.mxu0 %v4335_v3  ;;  %1919 = vmatpush1.bf16.msra.mxu1 %v4372_v4 }
 0x122   : > { %1920 = vmatprep.subr.bf16.mxu1 %v4377_v6 }
 0x124   : > { %1839 = vmatpush1.bf16.msra.mxu0 %v4333_v7 }
 0x125   : > { %1840 = vmatprep.subr.bf16.mxu0 %v4341_v8  ;;  %1921 = vmatpush1.bf16.msra.mxu1 %v4375_v9 }
 0x126   : > { %1922 = vmatprep.subr.bf16.mxu1 %v4380_v10 }
 0x128   : > { %1841 = vmatpush1.bf16.msra.mxu0 %v4339_v11  ;;  %v4987_v11 = vld [vmem:[%s5139_s4] sm:$0xff] }
 0x129   : > { %1923 = vmatpush1.bf16.msra.mxu1 %v4378_v12  ;;  %3789 = vmatprep.subr.bf16.mxu0 %v4382_v13 }
 0x12a   : > { %3875 = vmatprep.subr.bf16.mxu1 %v4691_v18 }
 0x12b   : > { %1859 = vmatmul.mubr.bf16.vlgmr.msra.gmra.mrb[4].mxu0 %v4923_v40 }
 0x12c   : > { %1941 = vmatmul.mubr.bf16.vlgmr.msra.gmra.mrb[4].mxu1 %v4923_v40  ;;  %3790 = vmatpush3.bf16.msra.mxu0 %v4383_v15 }
 0x12d   : > { %3876 = vmatpush3.bf16.msra.mxu1 %v4381_v16  ;;  %3791 = vmatprep.subr.bf16.mxu0 %v4385_v17 }
 0x12e   : > { %3877 = vmatprep.subr.bf16.mxu1 %v4691_v18  ;;  %1981 = vmatprep.mubr.bf16.mxu0 %v4911_v48  ;;  %v4395_v48 = vld [vmem:[#allocation5 + $0x140] ss:$36 sps:$4 sm:$0xff]  }
 0x12f   : > { %3891 = vmatprep.mubr.msk.bf16.mxu1 %vm4692_vm0, %v4691_v18 }
 0x130   : > { %3792 = vmatpush3.bf16.msra.mxu0 %v4386_v19 }
 0x131   : > { %3878 = vmatpush3.bf16.msra.mxu1 %v4384_v20  ;;  %3793 = vmatprep.subr.bf16.mxu0 %v4388_v21 }
 0x132   : > { %3879 = vmatprep.subr.bf16.mxu1 %v4691_v18 }
 0x134   : > { %3794 = vmatpush3.bf16.msra.mxu0 %v4389_v22 }
 0x135   : > { %3880 = vmatpush3.bf16.msra.mxu1 %v4387_v23  ;;  %3795 = vmatprep.subr.bf16.mxu0 %v4391_v24 }
 0x136   : > { %3881 = vmatprep.subr.bf16.mxu1 %v4691_v18 }
 0x138   : > { %3796 = vmatpush3.bf16.msra.mxu0 %v4392_v25 }
 0x139   : > { %3882 = vmatpush3.bf16.msra.mxu1 %v4390_v26  ;;  %3797 = vmatprep.subr.bf16.mxu0 %v4394_v27 }
 0x13a   : > { %3883 = vmatprep.subr.bf16.mxu1 %v4691_v18 }
 0x13c   : > { %3798 = vmatpush3.bf16.msra.mxu0 %v4395_v48 }
 0x13d   : > { %3884 = vmatpush3.bf16.msra.mxu1 %v4393_v28  ;;  %3799 = vmatprep.subr.bf16.mxu0 %v4397_v29 }
 0x13e   : > { %3885 = vmatprep.subr.bf16.mxu1 %v4691_v18 }
 0x140   : > { %3800 = vmatpush3.bf16.msra.mxu0 %v4398_v30 }
 0x141   : > { %3886 = vmatpush3.bf16.msra.mxu1 %v4396_v31  ;;  %3801 = vmatprep.subr.bf16.mxu0 %v4400_v32 }
 0x142   : > { %3887 = vmatprep.subr.bf16.mxu1 %v4691_v18 }
 0x144   : > { %3802 = vmatpush3.bf16.msra.mxu0 %v4401_v33 }
 0x145   : > { %3888 = vmatpush3.bf16.msra.mxu1 %v4399_v34  ;;  %3803 = vmatprep.subr.bf16.mxu0 %v4403_v35 }
 0x146   : > { %3889 = vmatprep.subr.bf16.mxu1 %v4691_v18 }
 0x148   : > { %3804 = vmatpush3.bf16.msra.mxu0 %v4404_v36 }
 0x149   : > { %3890 = vmatpush3.bf16.msra.mxu1 %v4402_v37  ;;  %3919 = vmatprep.subr.bf16.mxu0 %v4691_v18 }
 0x14a   : > { %3895 = vmatprep.subr.bf16.mxu1 %v4691_v18 }
 0x14b   : > { %1982 = vmatmul.mubr.bf16.vlgmr.msra.gmra.mrb[8].mxu0 %v4916_v5 }
 0x14c   : > { %3892 = vmatmul.mubr.bf16.vlgmr.msra.gmra.mrb[8].mxu1 %v4923_v40  ;;  %3921 = vmatprep.mubr.msk.bf16.mxu0 %vm4692_vm0, %v4691_v18 }
 0x14d   : > { %3897 = vmatprep.mubr.msk.bf16.mxu1 %vm4692_vm0, %v4691_v18 }
 0x19e   : > { %v1696_v38 = vpop.f32.mrb[0].mxu0  ;;  %v1778_v39 = vpop.f32.mrb[0].mxu1 }
 0x19f   : > { %v1698_v41 = vpop.f32.mrb[1].mxu0  ;;  %v1780_v42 = vpop.f32.mrb[1].mxu1  ;;  %v2030_v40 = vpack.c.bf16 %v1696_v38, %v1696_v38  ;;  %v4974_v63 = vpack.c.bf16 %v1778_v39, %v1778_v39 }
 0x1a0   : > { %v2031_v43 = vpack.c.bf16 %v1780_v42, %v1780_v42  ;;  %v1700_v44 = vpop.f32.mrb[2].mxu0  ;;  %v1782_v45 = vpop.f32.mrb[2].mxu1  ;;  %v2253_v49 = vpack.c.bf16 %v1698_v41, %v1698_v41 }
 0x1a1   : > { %v1701_v46 = vpop.f32.mrb[3].mxu0  ;;  %v1783_v47 = vpop.f32.mrb[3].mxu1 }
 0x1a2   : > { %v2037_v5 = vsel %vm2032_vm1, %v2031_v43, 0  ;;  %2144 = vrot.lane.b32.xlu1 %v2031_v43, %s4693_s24 }
 0x1a3   : > { %3896 = vmatpush3.bf16.xpose.msra.mxu1 %v2037_v5 }
 0x1a4   : > { %3901 = vmatprep.subr.bf16.mxu1 %v4691_v18 }
 0x1a6   : > { %2141 = vrot.lane.b32.xlu1 %v2030_v40, %s4693_s24 }
 0x1aa   : > { %3898 = vmatmul.mubr.msk.bf16.vlgmr.msra.gmra.mrb[12].mxu1 %vm2032_vm1, %v2030_v40  ;;  %2361 = vrot.lane.b32.xlu1 %v2253_v49, %s4693_s24 }
 0x1ab   : > { %3903 = vmatprep.mubr.msk.bf16.mxu1 %vm4692_vm0, %v4691_v18 }
 0x1fe   : > { %v1860_v50 = vpop.f32.mrb[4].mxu0 }
 0x1ff   : > { %v2254_v51 = vpack.c.bf16 %v1860_v50, %v1860_v50  ;;  %v1862_v52 = vpop.f32.mrb[5].mxu0  ;;  %v1942_v53 = vpop.f32.mrb[4].mxu1 }
 0x200   : > { %v4962_v54 = vpack.c.bf16 %v1862_v52, %v1862_v52  ;;  %v4964_v55 = vpack.c.bf16 %v1942_v53, %v1942_v53  ;;  %v4966_v56 = vpop.f32.mrb[5].mxu1  ;;  %v1864_v57 = vpop.f32.mrb[6].mxu0 }
 0x201   : > { %v2259_v58 = vsel %vm2032_vm1, %v2254_v51, 0  ;;  %v1946_v59 = vpop.f32.mrb[6].mxu1  ;;  %v1865_v60 = vpop.f32.mrb[7].mxu0 }
 0x202   : > { %3920 = vmatpush3.bf16.xpose.msra.mxu0 %v2259_v58  ;;  %2584 = vrot.lane.b32.xlu1 %v4962_v54, %s4693_s24  ;;  %v2098_v61 = vsel %vm2096_vm2, %v4964_v55, 0  ;;  %v1947_v62 = vpop.f32.mrb[7].mxu1  ;;  %v2479_v38 = vsel %vm2032_vm1, %v4962_v54, 0 }
 0x203   : > { %3902 = vmatpush3.bf16.msra.mxu1 %v2098_v61  ;;  %3931 = vmatprep.subr.bf16.mxu0 %v4691_v18 }
 0x204   : > { %3907 = vmatprep.subr.bf16.mxu1 %v4691_v18 }
 0x206   : > { %2581 = vrot.lane.b32.xlu1 %v4974_v63, %s4693_s24 }
 0x209   : > { %3922 = vmatmul.mubr.msk.bf16.vlgmr.msra.gmra.mrb[12].mxu0 %vm2032_vm1, %v2253_v49 }
 0x20a   : > { %3933 = vmatprep.mubr.msk.bf16.mxu0 %vm4692_vm0, %v4691_v18 }
 0x214   : > { %v2145_v30 = vpop.permute.xlu1 %2144 }
 0x215   : > { %v2150_v41 = vsel %vm2032_vm1, %v2145_v30, 0 }
 0x218   : > { %v2142_v34 = vpop.permute.xlu1 %2141 }
 0x21c   : > { %v2362_v36 = vpop.permute.xlu1 %2361 }
 0x21e   : > { %v3805_v0 = vpop.f32.mrb[8].mxu0 }
 0x21f   : > { %v2023_v1 = vpop.f32.mrb[8].mxu1  ;;  %v3806_v2 = vpop.f32.mrb[9].mxu0 }
 0x220   : > { %v3893_v3 = vpop.f32.mrb[9].mxu1  ;;  %v3807_v4 = vadd.f32 %v3806_v2, %v3805_v0  ;;  %v3808_v6 = vpop.f32.mrb[10].mxu0 }
 0x221   : > { %v2026_v7 = vpop.f32.mrb[10].mxu1  ;;  %v3809_v8 = vpop.f32.mrb[11].mxu0 }
 0x222   : > { %v4982_v9 = vadd.f32 %v3807_v4, %v2023_v1  ;;  %v3894_v10 = vpop.f32.mrb[11].mxu1 }
 0x274   : > { %v2585_v42 = vpop.permute.xlu1 %2584 }
 0x275   : > { %v2590_v43 = vsel %vm2032_vm1, %v2585_v42, 0  ;;  %v2533_v42 = vpack.c.bf16 %v4982_v9, %v4982_v9 }
 0x278   : > { %v2582_v44 = vpop.permute.xlu1 %2581 }
 0x27d   : > { %v2073_v12 = vpop.f32.mrb[12].mxu1 }
 0x27e   : > { %v2074_v13 = vadd.f32 %v2073_v12, %v4987_v11  ;;  %v3899_v15 = vpop.f32.mrb[13].mxu1 }
 0x27f   : > { %v2076_v16 = vpop.f32.mrb[14].mxu1 }
 0x280   : > { %v3900_v17 = vpop.f32.mrb[15].mxu1  ;;  %v2080_v19 = vsel %vm2079_vm3, %v2074_v13, -inf }
 0x281   : > { %2081 = vmax.xlane.f32.xlu0 %v2080_v19 }
 0x2dc   : > { %v2295_v20 = vpop.f32.mrb[12].mxu0 }
 0x2dd   : > { %v3923_v21 = vpop.f32.mrb[13].mxu0  ;;  %v2296_v28 = vadd.f32 %v2295_v20, %v4987_v11 }
 0x2de   : > { %v2298_v22 = vpop.f32.mrb[14].mxu0 }
 0x2df   : > { %v3924_v23 = vpop.f32.mrb[15].mxu0  ;;  %v2301_v29 = vsel %vm2079_vm3, %v2296_v28, -inf }
 0x30e   : > { %v2082_v24 = vpop.xlane.xlu0 %2081 }
 0x30f   : > { %v2083_v25 = vsub.f32 %v2074_v13, %v2082_v24 }
 0x311   : > { %v2084_v26 = vmul.f32 1.442695, %v2083_v25 }
 0x313   : > { %4501 = vpow2.f32 %v2084_v26 }
 0x31d   : > { %v4502_v27 = vpop.eup %4501 }
 0x31e   : > { %v2086_v48 = vsel %vm2079_vm3, %v4502_v27, 0.0 }
 0x31f   : > { %2087 = vadd.xlane.f32.xlu0 %v2086_v48 }
 0x335   : > { %2364 = vrot.lane.b32.xlu0 %v2254_v51, %s4693_s24 }
 0x354   : > { %2302 = vmax.xlane.f32.xlu0 %v2301_v29 }
 0x3ac   : > { %v2088_v31 = vpop.xlane.xlu0 %2087 }
 0x3ad   : > { %4503 = vrcp.f32 %v2088_v31 }
 0x3b0   : > { %v2365_v32 = vpop.permute.xlu0 %2364 }
 0x3b1   : > { %v2370_v33 = vsel %vm2032_vm1, %v2365_v32, 0 }
 0x3b2   : > { %3932 = vmatpush3.bf16.xpose.msra.mxu0 %v2370_v33 }
 0x3b3   : > { %3943 = vmatprep.subr.bf16.mxu0 %v4691_v18 }
 0x3b7   : > { %v4504_v35 = vpop.eup %4503 }
 0x3b8   : > { %v2090_v37 = vmul.f32 %v4504_v35, %v4502_v27 }
 0x3b9   : > { %3934 = vmatmul.mubr.msk.bf16.vlgmr.msra.gmra.mrb[16].mxu0 %vm2032_vm1, %v2362_v36 }
 0x3ba   : > { %3944 = vmatpush3.bf16.xpose.msra.mxu0 %v2479_v38  ;;  %v2091_v39 = vpack.c.bf16 %v2090_v37, %v2090_v37  ;;  %3945 = vmatprep.mubr.msk.bf16.mxu0 %vm4692_vm0, %v4691_v18 }
 0x3bb   : > { %3955 = vmatprep.subr.bf16.mxu0 %v4691_v18 }
 0x3bc   : > { %3904 = vmatmul.mubr.msk.bf16.vlgmr.msra.gmra.mrb[16].mxu1 %vm2079_vm3, %v2091_v39 }
 0x3bd   : > { %3908 = vmatpush3.bf16.xpose.msra.mxu1 %v2150_v41  ;;  %3909 = vmatprep.mubr.msk.bf16.mxu1 %vm4692_vm0, %v4691_v18  ;;  %v2313_v41 = vpack.c.bf16 %v4966_v56, %v4966_v56 }
 0x3be   : > { %3913 = vmatprep.subr.bf16.mxu1 %v4691_v18 }
 0x3c1   : > { %3946 = vmatmul.mubr.msk.bf16.vlgmr.msra.gmra.mrb[20].mxu0 %vm2032_vm1, %v4974_v63 }
 0x3c2   : > { %3956 = vmatpush3.bf16.xpose.msra.mxu0 %v2590_v43  ;;  %3957 = vmatprep.mubr.msk.bf16.mxu0 %vm4692_vm0, %v4691_v18 }
 0x3c4   : > { %3910 = vmatmul.mubr.msk.bf16.vlgmr.msra.gmra.mrb[20].mxu1 %vm2032_vm1, %v2142_v34 }
 0x3c5   : > { %3915 = vmatprep.mubr.msk.bf16.mxu1 %vm4692_vm0, %v4691_v18 }
 0x3c9   : > { %3958 = vmatmul.mubr.msk.bf16.vlgmr.msra.gmra.mrb[24].mxu0 %vm2032_vm1, %v2582_v44 }
 0x3e1   : > { %v2303_v45 = vpop.xlane.xlu0 %2302 }
 0x3e2   : > { %v2304_v5 = vsub.f32 %v2296_v28, %v2303_v45 }
 0x3e4   : > { %v2305_v53 = vmul.f32 1.442695, %v2304_v5 }
 0x3e6   : > { %4505 = vpow2.f32 %v2305_v53 }
 0x3f0   : > { %v4506_v16 = vpop.eup %4505 }
 0x3f1   : > { %v2307_v19 = vsel %vm2079_vm3, %v4506_v16, 0.0 }
 0x48c   : > { %v2406_v46 = vpop.f32.mrb[16].mxu0 }
 0x48d   : > { %v3935_v47 = vpop.f32.mrb[17].mxu0  ;;  %v2407_v1 = vadd.f32 %v2406_v46, %v4987_v11 }
 0x48e   : > { %v2409_v40 = vpop.f32.mrb[18].mxu0 }
 0x48f   : > { %v5017_v49 = vpop.f32.mrb[16].mxu1  ;;  %v3936_v50 = vpop.f32.mrb[19].mxu0  ;;  %v2412_v12 = vsel %vm2079_vm3, %v2407_v1, -inf }
 0x490   : > { %v3905_v51 = vpop.f32.mrb[17].mxu1  ;;  %v2318_v50 = vsel %vm2096_vm2, %v2313_v41, 0 }
 0x491   : > { %v2137_v52 = vpop.f32.mrb[18].mxu1 }
 0x492   : > { %v3906_v54 = vpop.f32.mrb[19].mxu1 }
 0x494   : > { %v2515_v57 = vpop.f32.mrb[20].mxu0 }
 0x495   : > { %v3947_v58 = vpop.f32.mrb[21].mxu0  ;;  %v2516_v8 = vadd.f32 %v2515_v57, %v4987_v11 }
 0x496   : > { %v2518_v59 = vpop.f32.mrb[22].mxu0 }
 0x497   : > { %v2186_v60 = vpop.f32.mrb[20].mxu1  ;;  %v3948_v61 = vpop.f32.mrb[23].mxu0  ;;  %v2521_v17 = vsel %vm2079_vm3, %v2516_v8, -inf }
 0x498   : > { %v2187_v62 = vadd.f32 %v2186_v60, %v4987_v11  ;;  %v3911_v63 = vpop.f32.mrb[21].mxu1  ;;  %v2538_v60 = vsel %vm2096_vm2, %v2533_v42, 0 }
 0x499   : > { %v2189_v0 = vpop.f32.mrb[22].mxu1 }
 0x49a   : > { %v3912_v2 = vpop.f32.mrb[23].mxu1  ;;  %v2192_v3 = vsel %vm2079_vm3, %v2187_v62, -inf }
 0x49b   : > { %2193 = vmax.xlane.f32.xlu1 %v2192_v3 }
 0x49c   : > { %v2626_v4 = vpop.f32.mrb[24].mxu0 }
 0x49d   : > { %v2627_v6 = vadd.f32 %v2626_v4, %v4987_v11  ;;  %v3959_v7 = vpop.f32.mrb[25].mxu0  ;;  %v4405_v4 = vld [vmem:[#allocation7] ss:$12 sps:$4 sm:$0xff]  }
 0x49e   : > { %v2629_v10 = vpop.f32.mrb[26].mxu0  ;;  %v4410_v7 = vld [vmem:[#allocation7 + $0x1c] ss:$12 sps:$4 sm:$0xff]  }
 0x49f   : > { %2413 = vmax.xlane.f32.xlu1 %v2412_v12  ;;  %v3960_v13 = vpop.f32.mrb[27].mxu0  ;;  %v2632_v15 = vsel %vm2079_vm3, %v2627_v6, -inf  ;;  %v4413_v10 = vld [vmem:[#allocation7 + $0x34] ss:$12 sps:$4 sm:$0xff]  }
 0x4a0   : > { %2633 = vmax.xlane.f32.xlu0 %v2632_v15  ;;  %v4432_v12 = vld [vmem:[#allocation7 + $0xc8] ss:$12 sps:$4 sm:$0xff]   ;;  %v4411_v15 = vld [vmem:[#allocation7 + $0x30] ss:$12 sps:$4 sm:$0xff]  }
 0x4a1   : > { %v4433_v13 = vld [vmem:[#allocation7 + $0x8] ss:$12 sps:$4 sm:$0xff]  }
 0x4a3   : > { %2522 = vmax.xlane.f32.xlu1 %v2521_v17  ;;  %v4416_v17 = vld [vmem:[#allocation7 + $0x4c] ss:$12 sps:$4 sm:$0xff]  }
 0x4a4   : > { %2308 = vadd.xlane.f32.xlu0 %v2307_v19  ;;  %v4438_v19 = vld [vmem:[#allocation7 + $0x20] ss:$12 sps:$4 sm:$0xff]  }
 0x4ba   : > { %2205 = vrot.lane.b32.xlu0 %v4964_v55, %s4693_s24 }
 0x528   : > { %v2194_v20 = vpop.xlane.xlu1 %2193 }
 0x529   : > { %v2195_v11 = vsub.f32 %v2187_v62, %v2194_v20  ;;  %v4442_v20 = vld [vmem:[#allocation7 + $0xf8] ss:$12 sps:$4 sm:$0xff]  }
 0x52b   : > { %v2196_v21 = vmul.f32 1.442695, %v2195_v11  ;;  %v4414_v11 = vld [vmem:[#allocation7 + $0x48] ss:$12 sps:$4 sm:$0xff]  }
 0x52c   : > { %v2414_v22 = vpop.xlane.xlu1 %2413 }
 0x52d   : > { %4507 = vpow2.f32 %v2196_v21  ;;  %v2415_v23 = vsub.f32 %v2407_v1, %v2414_v22  ;;  %v2634_v24 = vpop.xlane.xlu0 %2633  ;;  %v4419_v21 = vld [vmem:[#allocation7 + $0x64] ss:$12 sps:$4 sm:$0xff]  }
 0x52e   : > { %v2635_v25 = vsub.f32 %v2627_v6, %v2634_v24  ;;  %v4407_v6 = vld [vmem:[#allocation7 + $0x4] ss:$12 sps:$4 sm:$0xff]   ;;  %v4417_v24 = vld [vmem:[#allocation7 + $0x60] ss:$12 sps:$4 sm:$0xff]  }
 0x52f   : > { %v2416_v26 = vmul.f32 1.442695, %v2415_v23  ;;  %3208 = vmatprep.subr.bf16.mxu0 %v4407_v6  ;;  %v4443_v22 = vld [vmem:[#allocation7 + $0x38] ss:$12 sps:$4 sm:$0xff]   ;;  %v4447_v23 = vld [vmem:[#allocation7 + $0x110] ss:$12 sps:$4 sm:$0xff]  }
 0x530   : > { %v2636_v27 = vmul.f32 1.442695, %v2635_v25  ;;  %v2523_v48 = vpop.xlane.xlu1 %2522  ;;  %3209 = vmatpush1.bf16.msra.mxu0 %v4405_v4  ;;  %v4422_v25 = vld [vmem:[#allocation7 + $0x7c] ss:$12 sps:$4 sm:$0xff]  }
 0x531   : > { %4509 = vpow2.f32 %v2416_v26  ;;  %v2524_v28 = vsub.f32 %v2516_v8, %v2523_v48  ;;  %v2309_v29 = vpop.xlane.xlu0 %2308  ;;  %v4408_v8 = vld [vmem:[#allocation7 + $0x18] ss:$12 sps:$4 sm:$0xff]   ;;  %3210 = vmatprep.subr.bf16.mxu0 %v4410_v7  ;;  %v4448_v26 = vld [vmem:[#allocation7 + $0x50] ss:$12 sps:$4 sm:$0xff]  }
 0x532   : > { %4511 = vpow2.f32 %v2636_v27  ;;  %v4452_v27 = vld [vmem:[#allocation7 + $0x128] ss:$12 sps:$4 sm:$0xff]   ;;  %v4420_v48 = vld [vmem:[#allocation7 + $0x78] ss:$12 sps:$4 sm:$0xff]  }
 0x533   : > { %v2525_v30 = vmul.f32 1.442695, %v2524_v28  ;;  %v4425_v28 = vld [vmem:[#allocation7 + $0x94] ss:$12 sps:$4 sm:$0xff]  }
 0x534   : > { %3211 = vmatpush1.bf16.msra.mxu0 %v4408_v8 }
 0x535   : > { %4513 = vpow2.f32 %v2525_v30  ;;  %v2206_v31 = vpop.permute.xlu0 %2205  ;;  %3212 = vmatprep.subr.bf16.mxu0 %v4413_v10  ;;  %v4457_v30 = vld [vmem:[#allocation7 + $0x140] ss:$12 sps:$4 sm:$0xff]  }
 0x536   : > { %v2211_v55 = vsel %vm2096_vm2, %v2206_v31, 0  ;;  %v4423_v31 = vld [vmem:[#allocation7 + $0x90] ss:$12 sps:$4 sm:$0xff]  }
 0x537   : > { %v4508_v32 = vpop.eup %4507  ;;  %3914 = vmatpush3.bf16.msra.mxu1 %v2211_v55  ;;  %v4428_v55 = vld [vmem:[#allocation7 + $0xac] ss:$12 sps:$4 sm:$0xff]  }
 0x538   : > { %v2198_v33 = vsel %vm2079_vm3, %v4508_v32, 0.0  ;;  %3925 = vmatprep.subr.bf16.mxu1 %v4691_v18  ;;  %3213 = vmatpush1.bf16.msra.mxu0 %v4411_v15 }
 0x539   : > { %2199 = vadd.xlane.f32.xlu1 %v2198_v33  ;;  %3214 = vmatprep.subr.bf16.mxu0 %v4416_v17  ;;  %v4462_v33 = vld [vmem:[#allocation7 + $0x158] ss:$12 sps:$4 sm:$0xff]  }
 0x53b   : > { %v4510_v34 = vpop.eup %4509 }
 0x53c   : > { %v4512_v35 = vpop.eup %4511  ;;  %v2418_v36 = vsel %vm2079_vm3, %v4510_v34, 0.0  ;;  %3215 = vmatpush1.bf16.msra.mxu0 %v4414_v11 }
 0x53d   : > { %2419 = vadd.xlane.f32.xlu1 %v2418_v36  ;;  %v2638_v37 = vsel %vm2079_vm3, %v4512_v35, 0.0  ;;  %3216 = vmatprep.subr.bf16.mxu0 %v4419_v21  ;;  %v4463_v36 = vld [vmem:[#allocation7 + $0x98] ss:$12 sps:$4 sm:$0xff]  }
 0x53e   : > { %2639 = vadd.xlane.f32.xlu0 %v2638_v37  ;;  %v4429_v37 = vld [vmem:[#allocation7 + $0xc0] ss:$12 sps:$4 sm:$0xff]  }
 0x53f   : > { %v4514_v38 = vpop.eup %4513 }
 0x540   : > { %v2527_v39 = vsel %vm2079_vm3, %v4514_v38, 0.0  ;;  %3217 = vmatpush1.bf16.msra.mxu0 %v4417_v24  ;;  %v4469_v24 = vld [vmem:[#allocation7 + $0x180] ss:$12 sps:$4 sm:$0xff]  }
 0x541   : > { %2528 = vadd.xlane.f32.xlu1 %v2527_v39  ;;  %3218 = vmatprep.subr.bf16.mxu0 %v4422_v25  ;;  %v4434_v39 = vld [vmem:[#allocation7 + $0xd8] ss:$12 sps:$4 sm:$0xff]   ;;  %v4472_v25 = vld [vmem:[#allocation7 + $0x188] ss:$12 sps:$4 sm:$0xff]  }
 0x544   : > { %3219 = vmatpush1.bf16.msra.mxu0 %v4420_v48  ;;  %v4476_v48 = vld [vmem:[#allocation7 + $0x1a0] ss:$12 sps:$4 sm:$0xff]  }
 0x545   : > { %3220 = vmatprep.subr.bf16.mxu0 %v4425_v28  ;;  %v4479_v28 = vld [vmem:[#allocation7 + $0x1b4] ss:$12 sps:$4 sm:$0xff]  }
 0x548   : > { %3221 = vmatpush1.bf16.msra.mxu0 %v4423_v31  ;;  %v4481_v31 = vld [vmem:[#allocation7 + $0x1c8] ss:$12 sps:$4 sm:$0xff]  }
 0x549   : > { %3222 = vmatprep.subr.bf16.mxu0 %v4428_v55  ;;  %v4484_v55 = vld [vmem:[#allocation7 + $0x1d0] ss:$12 sps:$4 sm:$0xff]  }
 0x552   : > { %2425 = vrot.lane.b32.xlu1 %v2313_v41, %s4693_s24  ;;  %v4441_v41 = vld [vmem:[#allocation7 + $0xf4] ss:$12 sps:$4 sm:$0xff]  }
 0x556   : > { %2645 = vrot.lane.b32.xlu1 %v2533_v42, %s4693_s24  ;;  %v4439_v42 = vld [vmem:[#allocation7 + $0xf0] ss:$12 sps:$4 sm:$0xff]  }
 0x5c6   : > { %v2200_v43 = vpop.xlane.xlu1 %2199 }
 0x5c7   : > { %4515 = vrcp.f32 %v2200_v43  ;;  %v4446_v43 = vld [vmem:[#allocation7 + $0x10c] ss:$12 sps:$4 sm:$0xff]  }
 0x5c8   : > { %4517 = vrcp.f32 %v2309_v29  ;;  %v4453_v29 = vld [vmem:[#allocation7 + $0x68] ss:$12 sps:$4 sm:$0xff]  }
 0x5ca   : > { %v2420_v44 = vpop.xlane.xlu1 %2419 }
 0x5cb   : > { %4519 = vrcp.f32 %v2420_v44  ;;  %v2640_v57 = vpop.xlane.xlu0 %2639  ;;  %v4444_v44 = vld [vmem:[#allocation7 + $0x108] ss:$12 sps:$4 sm:$0xff]  }
 0x5ce   : > { %v2529_v40 = vpop.xlane.xlu1 %2528 }
 0x5cf   : > { %4521 = vrcp.f32 %v2529_v40  ;;  %v4461_v40 = vld [vmem:[#allocation7 + $0x154] ss:$12 sps:$4 sm:$0xff]  }
 0x5d0   : > { %4523 = vrcp.f32 %v2640_v57  ;;  %v4464_v57 = vld [vmem:[#allocation7 + $0x168] ss:$12 sps:$4 sm:$0xff]  }
 0x5d1   : > { %v4516_v45 = vpop.eup %4515 }
 0x5d2   : > { %v2202_v46 = vmul.f32 %v4516_v45, %v4508_v32  ;;  %v4518_v5 = vpop.eup %4517  ;;  %v2426_v9 = vpop.permute.xlu1 %2425  ;;  %v4458_v32 = vld [vmem:[#allocation7 + $0x80] ss:$12 sps:$4 sm:$0xff]   ;;  %v4451_v45 = vld [vmem:[#allocation7 + $0x124] ss:$12 sps:$4 sm:$0xff]  }
 0x5d3   : > { %v2311_v56 = vmul.f32 %v4518_v5, %v4506_v16  ;;  %v2431_v53 = vsel %vm2096_vm2, %v2426_v9, 0  ;;  %v4437_v16 = vld [vmem:[#allocation7 + $0xe0] ss:$12 sps:$4 sm:$0xff]   ;;  %v4454_v5 = vld [vmem:[#allocation7 + $0x138] ss:$12 sps:$4 sm:$0xff]  }
 0x5d4   : > { %v2203_v47 = vpack.c.bf16 %v2202_v46, %v2202_v46  ;;  %v4449_v46 = vld [vmem:[#allocation7 + $0x120] ss:$12 sps:$4 sm:$0xff]  }
 0x5d5   : > { %v2312_v51 = vpack.c.bf16 %v2311_v56, %v2311_v56  ;;  %v4520_v52 = vpop.eup %4519 }
 0x5d6   : > { %3916 = vmatmul.mubr.msk.bf16.vlgmr.msra.gmra.mrb[24].mxu1 %vm2079_vm3, %v2203_v47  ;;  %v2422_v54 = vmul.f32 %v4520_v52, %v4510_v34  ;;  %v2646_v62 = vpop.permute.xlu1 %2645  ;;  %v4426_v34 = vld [vmem:[#allocation7 + $0xa8] ss:$12 sps:$4 sm:$0xff]  }
 0x5d7   : > { %3926 = vmatpush3.bf16.msra.mxu1 %v2318_v50  ;;  %3927 = vmatprep.mubr.msk.bf16.mxu1 %vm4692_vm0, %v4691_v18  ;;  %v2651_v1 = vsel %vm2096_vm2, %v2646_v62, 0  ;;  %v4456_v47 = vld [vmem:[#allocation7 + $0x13c] ss:$12 sps:$4 sm:$0xff]   ;;  %v4471_v62 = vld [vmem:[#allocation7 + $0x184] ss:$12 sps:$4 sm:$0xff]  }
 0x5d8   : > { %3937 = vmatprep.subr.bf16.mxu1 %v4691_v18  ;;  %v2423_v58 = vpack.c.bf16 %v2422_v54, %v2422_v54  ;;  %3223 = vmatpush1.bf16.msra.mxu0 %v4426_v34  ;;  %v4459_v50 = vld [vmem:[#allocation7 + $0x150] ss:$12 sps:$4 sm:$0xff]  }
 0x5d9   : > { %v4522_v59 = vpop.eup %4521  ;;  %v4467_v54 = vld [vmem:[#allocation7 + $0x170] ss:$12 sps:$4 sm:$0xff]  }
 0x5da   : > { %v2531_v61 = vmul.f32 %v4522_v59, %v4514_v38  ;;  %v4524_v0 = vpop.eup %4523  ;;  %v4436_v38 = vld [vmem:[#allocation7 + $0xdc] ss:$12 sps:$4 sm:$0xff]  }
 0x5db   : > { %v2642_v2 = vmul.f32 %v4524_v0, %v4512_v35  ;;  %v4431_v35 = vld [vmem:[#allocation7 + $0xc4] ss:$12 sps:$4 sm:$0xff]   ;;  %v4491_v34 = vld [vmem:[#allocation7 + $0x1fc] ss:$12 sps:$4 sm:$0xff]  }
 0x5dc   : > { %v2532_v63 = vpack.c.bf16 %v2531_v61, %v2531_v61  ;;  %3224 = vmatprep.subr.bf16.mxu0 %v4431_v35  ;;  %v4489_v35 = vld [vmem:[#allocation7 + $0x1f8] ss:$12 sps:$4 sm:$0xff]  }
 0x5dd   : > { %v2643_v3 = vpack.c.bf16 %v2642_v2, %v2642_v2  ;;  %3225 = vmatpush1.bf16.msra.mxu0 %v4429_v37  ;;  %v4495_v37 = vld [vmem:[#allocation7 + $0x214] ss:$12 sps:$4 sm:$0xff]  }
 0x5de   : > { %3928 = vmatmul.mubr.msk.bf16.vlgmr.msra.gmra.mrb[28].mxu1 %vm2079_vm3, %v2312_v51  ;;  %3226 = vmatprep.subr.bf16.mxu0 %v4436_v38  ;;  %v4493_v38 = vld [vmem:[#allocation7 + $0x210] ss:$12 sps:$4 sm:$0xff]  }
 0x5df   : > { %3938 = vmatpush3.bf16.msra.mxu1 %v2431_v53  ;;  %3939 = vmatprep.mubr.msk.bf16.mxu1 %vm4692_vm0, %v4691_v18  ;;  %v4466_v53 = vld [vmem:[#allocation7 + $0x16c] ss:$12 sps:$4 sm:$0xff]  }
 0x5e0   : > { %3949 = vmatprep.subr.bf16.mxu1 %v4691_v18 }
 0x5e1   : > { %3227 = vmatpush1.bf16.msra.mxu0 %v4434_v39  ;;  %v4496_v39 = vld [vmem:[#allocation7 + $0x218] ss:$12 sps:$4 sm:$0xff]  }
 0x5e2   : > { %3228 = vmatprep.subr.bf16.mxu0 %v4441_v41  ;;  %v4499_v41 = vld [vmem:[#allocation7 + $0x22c] ss:$12 sps:$4 sm:$0xff]  }
 0x5e5   : > { %3229 = vmatpush1.bf16.msra.mxu0 %v4439_v42 }
 0x5e6   : > { %3940 = vmatmul.mubr.msk.bf16.vlgmr.msra.gmra.mrb[32].mxu1 %vm2079_vm3, %v2423_v58  ;;  %3230 = vmatprep.subr.bf16.mxu0 %v4446_v43  ;;  %v4468_v58 = vld [vmem:[#allocation7 + $0xb0] ss:$12 sps:$4 sm:$0xff]   ;;  %v4497_v43 = vld [vmem:[#allocation7 + $0x228] ss:$12 sps:$4 sm:$0xff]  }
 0x5e7   : > { %3950 = vmatpush3.bf16.msra.mxu1 %v2538_v60  ;;  %3951 = vmatprep.mubr.msk.bf16.mxu1 %vm4692_vm0, %v4691_v18 }
 0x5e8   : > { %3961 = vmatprep.subr.bf16.mxu1 %v4691_v18 }
 0x5e9   : > { %3231 = vmatpush1.bf16.msra.mxu0 %v4444_v44  ;;  %v4500_v44 = vld [vmem:[#allocation7 + $0x230] ss:$12 sps:$4 sm:$0xff]  }
 0x5ea   : > { %3232 = vmatprep.subr.bf16.mxu0 %v4451_v45 }
 0x5ed   : > { %3233 = vmatpush1.bf16.msra.mxu0 %v4449_v46 }
 0x5ee   : > { %3952 = vmatmul.mubr.msk.bf16.vlgmr.msra.gmra.mrb[36].mxu1 %vm2079_vm3, %v2532_v63  ;;  %3234 = vmatprep.subr.bf16.mxu0 %v4456_v47 }
 0x5ef   : > { %3962 = vmatpush3.bf16.msra.mxu1 %v2651_v1  ;;  %3963 = vmatprep.mubr.msk.bf16.mxu1 %vm4692_vm0, %v4691_v18 }
 0x5f0   : > { %3844 = vmatprep.subr.bf16.mxu1 %v4432_v12 }
 0x5f1   : > { %3235 = vmatpush1.bf16.msra.mxu0 %v4454_v5 }
 0x5f2   : > { %3236 = vmatprep.subr.bf16.mxu0 %v4461_v40 }
 0x5f5   : > { %3237 = vmatpush1.bf16.msra.mxu0 %v4459_v50 }
 0x5f6   : > { %3964 = vmatmul.mubr.msk.bf16.vlgmr.msra.gmra.mrb[40].mxu1 %vm2079_vm3, %v2643_v3  ;;  %3238 = vmatprep.subr.bf16.mxu0 %v4466_v53 }
 0x5f7   : > { %3845 = vmatpush3.bf16.msra.mxu1 %v4433_v13 }
 0x5f8   : > { %3846 = vmatprep.subr.bf16.mxu1 %v4437_v16 }
 0x5f9   : > { %3239 = vmatpush1.bf16.msra.mxu0 %v4464_v57 }
 0x5fa   : > { %3249 = vmatprep.subr.bf16.mxu0 %v4471_v62 }
 0x5fb   : > { %3847 = vmatpush3.bf16.msra.mxu1 %v4438_v19 }
 0x5fc   : > { %3848 = vmatprep.subr.bf16.mxu1 %v4442_v20 }
 0x5ff   : > { %3849 = vmatpush3.bf16.msra.mxu1 %v4443_v22 }
 0x600   : > { %3850 = vmatprep.subr.bf16.mxu1 %v4447_v23 }
 0x603   : > { %3851 = vmatpush3.bf16.msra.mxu1 %v4448_v26  ;;  %v4475_v26 = vld [vmem:[#allocation7 + $0x19c] ss:$12 sps:$4 sm:$0xff]  }
 0x604   : > { %3852 = vmatprep.subr.bf16.mxu1 %v4452_v27  ;;  %v4473_v27 = vld [vmem:[#allocation7 + $0x198] ss:$12 sps:$4 sm:$0xff]  }
 0x607   : > { %3853 = vmatpush3.bf16.msra.mxu1 %v4453_v29  ;;  %v4480_v29 = vld [vmem:[#allocation7 + $0x1b8] ss:$12 sps:$4 sm:$0xff]  }
 0x608   : > { %3854 = vmatprep.subr.bf16.mxu1 %v4457_v30  ;;  %v4483_v30 = vld [vmem:[#allocation7 + $0x1cc] ss:$12 sps:$4 sm:$0xff]  }
 0x60b   : > { %3855 = vmatpush3.bf16.msra.mxu1 %v4458_v32  ;;  %v4487_v32 = vld [vmem:[#allocation7 + $0x1e4] ss:$12 sps:$4 sm:$0xff]  }
 0x60c   : > { %3856 = vmatprep.subr.bf16.mxu1 %v4462_v33  ;;  %v4488_v33 = vld [vmem:[#allocation7 + $0x1e8] ss:$12 sps:$4 sm:$0xff]  }
 0x60f   : > { %3857 = vmatpush3.bf16.msra.mxu1 %v4463_v36  ;;  %v4492_v36 = vld [vmem:[#allocation7 + $0x200] ss:$12 sps:$4 sm:$0xff]  }
 0x610   : > { %3858 = vmatprep.subr.bf16.mxu1 %v4467_v54 }
 0x613   : > { %3859 = vmatpush3.bf16.msra.mxu1 %v4468_v58 }
 0x614   : > { %3967 = vmatprep.subr.bf16.mxu1 %v4691_v18 }
 0x6a9   : > { %v2247_v56 = vpop.f32.mrb[24].mxu1 }
 0x6aa   : > { %v3917_v9 = vpop.f32.mrb[25].mxu1 }
 0x6ab   : > { %v2250_v51 = vpop.f32.mrb[26].mxu1  ;;  %v2809_v9 = vlaneseq }
 0x6ac   : > { %v3918_v52 = vpop.f32.mrb[27].mxu1 }
 0x6ad   : > { %v2810_v51 = vshrl.u32 %v2809_v9, 7 }
 0x6af   : > { %v2819_v52 = vsub.s32 2, %v2810_v51  ;;  %v2811_v53 = vsub.s32 0, %v2810_v51  ;;  %v2815_v54 = vsub.s32 1, %v2810_v51 }
 0x6b1   : > { %v2354_v59 = vpop.f32.mrb[28].mxu1 }
 0x6b2   : > { %v3929_v60 = vpop.f32.mrb[29].mxu1 }
 0x6b3   : > { %v2357_v61 = vpop.f32.mrb[30].mxu1 }
 0x6b4   : > { %v3930_v63 = vpop.f32.mrb[31].mxu1 }
 0x6b9   : > { %v2467_v0 = vpop.f32.mrb[32].mxu1 }
 0x6ba   : > { %v4088_v1 = vpack.i.bf16 %v2247_v56, %v2467_v0  ;;  %v3941_v2 = vpop.f32.mrb[33].mxu1 }
 0x6bb   : > { %v2470_v3 = vpop.f32.mrb[34].mxu1 }
 0x6bc   : > { %v3942_v4 = vpop.f32.mrb[35].mxu1  ;;  %4089 = vrot.lane.b32.xlu1 %v4088_v1, %s4693_s24 }
 0x6c1   : > { %v5064_v6 = vpop.f32.mrb[36].mxu1 }
 0x6c2   : > { %v3953_v7 = vpop.f32.mrb[37].mxu1 }
 0x6c3   : > { %v2577_v8 = vpop.f32.mrb[38].mxu1 }
 0x6c4   : > { %v3954_v10 = vpop.f32.mrb[39].mxu1 }
 0x6c9   : > { %v2687_v12 = vpop.f32.mrb[40].mxu1 }
 0x6ca   : > { %2702 = vrot.lane.b32.xlu1 %v2687_v12, %s4693_s24  ;;  %v3965_v13 = vpop.f32.mrb[41].mxu1 }
 0x6cb   : > { %v2690_v15 = vpop.f32.mrb[42].mxu1 }
 0x6cc   : > { %v3966_v16 = vpop.f32.mrb[43].mxu1 }
 0x72e   : > { %v4090_v17 = vpop.permute.xlu1 %4089 }
 0x72f   : > { %v4092_v19 = vunpack.i.h.bf16 %v4090_v17  ;;  %v4091_v20 = vunpack.i.l.bf16 %v4090_v17 }
 0x731   : > { %v2705_v11 = vsel %vm2032_vm1, %v5017_v49, %v4092_v19  ;;  %v2706_v21 = vsel %vm2032_vm1, %v2354_v59, %v4091_v20  ;;  %v4477_v49 = vld [vmem:[#allocation7 + $0x1b0] ss:$12 sps:$4 sm:$0xff]  }
 0x732   : > { %v2708_v22 = vpack.c.bf16 %v2705_v11, %v2705_v11  ;;  %v2709_v23 = vpack.c.bf16 %v2706_v21, %v2706_v21 }
 0x734   : > { %3240 = vmatprep.mubr.bf16.mxu0 %v2709_v23  ;;  %3322 = vmatprep.mubr.bf16.mxu1 %v2709_v23 }
 0x735   : > { %3241 = vmatmul.mubr.bf16.vlgmr.msra.gmra.mrb[28].mxu0 %v2708_v22  ;;  %3323 = vmatmul.mubr.bf16.vlgmr.msra.gmra.mrb[44].mxu1 %v2708_v22 }
 0x736   : > { %3250 = vmatpush1.bf16.msra.mxu0 %v4469_v24  ;;  %3968 = vmatpush3.bf16.msra.mxu1 %v4472_v25 }
 0x737   : > { %3251 = vmatprep.subr.bf16.mxu0 %v4475_v26  ;;  %3969 = vmatprep.subr.bf16.mxu1 %v4691_v18 }
 0x738   : > { %3281 = vmatprep.mubr.bf16.mxu0 %v4690_v14  ;;  %3983 = vmatprep.mubr.msk.bf16.mxu1 %vm4692_vm0, %v4691_v18  ;;  %v4485_v14 = vld [vmem:[#allocation7 + $0x1e0] ss:$12 sps:$4 sm:$0xff]  }
 0x73a   : > { %3252 = vmatpush1.bf16.msra.mxu0 %v4473_v27  ;;  %3970 = vmatpush3.bf16.msra.mxu1 %v4476_v48 }
 0x73b   : > { %3253 = vmatprep.subr.bf16.mxu0 %v4479_v28  ;;  %3971 = vmatprep.subr.bf16.mxu1 %v4691_v18 }
 0x73c   : > { %v2703_v42 = vpop.permute.xlu1 %2702 }
 0x73d   : > { %v2707_v45 = vsel %vm2032_vm1, %v5064_v6, %v2703_v42 }
 0x73e   : > { %3254 = vmatpush1.bf16.msra.mxu0 %v4477_v49  ;;  %3972 = vmatpush3.bf16.msra.mxu1 %v4480_v29  ;;  %v2710_v46 = vpack.c.bf16 %v2707_v45, %v2707_v45 }
 0x73f   : > { %3255 = vmatprep.subr.bf16.mxu0 %v4483_v30  ;;  %3973 = vmatprep.subr.bf16.mxu1 %v4691_v18 }
 0x742   : > { %3256 = vmatpush1.bf16.msra.mxu0 %v4481_v31  ;;  %3974 = vmatpush3.bf16.msra.mxu1 %v4484_v55 }
 0x743   : > { %3257 = vmatprep.subr.bf16.mxu0 %v4487_v32  ;;  %3975 = vmatprep.subr.bf16.mxu1 %v4691_v18 }
 0x746   : > { %3258 = vmatpush1.bf16.msra.mxu0 %v4485_v14  ;;  %3976 = vmatpush3.bf16.msra.mxu1 %v4488_v33 }
 0x747   : > { %3259 = vmatprep.subr.bf16.mxu0 %v4491_v34  ;;  %3977 = vmatprep.subr.bf16.mxu1 %v4691_v18 }
 0x74a   : > { %3260 = vmatpush1.bf16.msra.mxu0 %v4489_v35  ;;  %3978 = vmatpush3.bf16.msra.mxu1 %v4492_v36 }
 0x74b   : > { %3261 = vmatprep.subr.bf16.mxu0 %v4495_v37  ;;  %3979 = vmatprep.subr.bf16.mxu1 %v4691_v18 }
 0x74e   : > { %3262 = vmatpush1.bf16.msra.mxu0 %v4493_v38  ;;  %3980 = vmatpush3.bf16.msra.mxu1 %v4496_v39 }
 0x74f   : > { %3263 = vmatprep.subr.bf16.mxu0 %v4499_v41  ;;  %3981 = vmatprep.subr.bf16.mxu1 %v4691_v18  ;;  %v2807_v18 = vld [vmem:[%s5138_s3] sm:$0x7] }
 0x750   : > { %v2820_v57 = vrot.slane %v2807_v18, %v2819_v52  ;;  %v2812_v58 = vrot.slane %v2807_v18, %v2811_v53  ;;  %v2816_v59 = vrot.slane %v2807_v18, %v2815_v54 }
 0x752   : > { %3264 = vmatpush1.bf16.msra.mxu0 %v4497_v43  ;;  %3982 = vmatpush3.bf16.msra.mxu1 %v4500_v44 }
 0x755   : > { %3282 = vmatmul.mubr.bf16.vlgmr.msra.gmra.mrb[28].mxu0 %v2710_v46  ;;  %3984 = vmatmul.mubr.bf16.vlgmr.msra.gmra.mrb[48].mxu1 %v2710_v46 }
 0x808   : > { %v3860_v47 = vpop.f32.mrb[44].mxu1 }
 0x809   : > { %v3861_v5 = vpop.f32.mrb[45].mxu1 }
 0x80a   : > { %v3862_v40 = vadd.f32 %v3861_v5, %v3860_v47  ;;  %v3863_v50 = vpop.f32.mrb[46].mxu1 }
 0x80b   : > { %v3864_v56 = vpop.f32.mrb[47].mxu1 }
 0x80c   : > { %v3325_v60 = vadd.f32 %v3862_v40, %v2820_v57 }
 0x828   : > { %v3283_v61 = vpop.f32.mrb[28].mxu0  ;;  %v3364_v62 = vpop.f32.mrb[48].mxu1 }
 0x829   : > { %v3987_v63 = vadd.f32 %v3283_v61, %v2812_v58  ;;  %v3365_v0 = vadd.f32 %v3364_v62, %v3325_v60  ;;  %v3285_v1 = vpop.f32.mrb[29].mxu0  ;;  %v3985_v2 = vpop.f32.mrb[49].mxu1 }
 0x82a   : > { %v3988_v3 = vadd.f32 %v3285_v1, %v2816_v59  ;;  %v3287_v4 = vpop.f32.mrb[30].mxu0  ;;  %v3367_v6 = vpop.f32.mrb[50].mxu1 }
 0x82b   : > { %3370 = vst [vmem:[%s269_s6] sm:$0xff] %v3987_v63  ;;  %3372 = vst [vmem:[%s269_s6 + $0x10] sm:$0xff] %v3365_v0  ;;  %v3288_v7 = vpop.f32.mrb[31].mxu0  ;;  %v3986_v8 = vpop.f32.mrb[51].mxu1 }
 0x82c   : > { %3371 = vst [vmem:[%s269_s6 + $0x8] sm:$0xff] %v3988_v3 }
 0x82d   : > { %4624 = shalt.err (!%p4621_p2)
}
 0x82e   : > { %s4625_s14 = scalar_lea.hbm %s5091_s10, 384  ;;  %s4629_s8 = scalar_lea.hbm %s5140_s5, 768 }
 0x82f   : > { %p4626_p13 = scmp.ne.s32.totalorder %s5091_s10, %s4625_s14  ;;  %p4630_p4 = scmp.lt.u32.totalorder %s5091_s10, %s5140_s5 }
 0x830   : > { %p4631_p7 = scmp.lt.u32.totalorder %s4629_s8, %s4625_s14  ;;  %p4633_p11 = scmp.lt.u32.totalorder %s4625_s14, %s5091_s10 }
 0x831   : > { %p4627_p6 = pnand %p4626_p13, %p5154_p0 }
 0x832   : > { %p4632_p8 = por %p4631_p7, %p4630_p4 }
 0x833   : > { %p4628_p10 = pneg %p4627_p6 }
 0x834   : > { %p4634_p1 = por %p4633_p11, %p4632_p8 }
 0x836   : > { %p4635_p3 = pnand %p4634_p1, %p4628_p10 }
 0x838   : > { %4638 = shalt.err (!%p4635_p3)
}
 0x839   : > { %4023 = dma.vmem_to_hbm [thread:$0]  (%p5154_p0), %s5093_s9, 384, %s5091_s10, %s3374_s22  }
 0x83a PF: > { %s3400_s13 = sand.u32 1, %s4669_s18   ;;  %p5155_p5 = scmp.ne.s32.totalorder %s5145_s25, 0 }
 0x83b   : > { %p5156_p9 = scmp.ge.s32.totalorder %s4681_s21, 2  ;;  %s3401_s6 = scalar_lea.sflag [#allocation4], %s3400_s13 }
 0x83d   : > { %p4037_p12 = pnand %p5156_p9, %p5155_p5 }
 0x83f   : > { %4664 = dma.done.wait (!%p4037_p12), %s3401_s6, 384  }
 0x840   : > { %4666 = vsyncadd (!%p4037_p12), %s3401_s6, 4294966912  ;;  %p19_p2 = scmp.ge.s32.totalorder %s4835_s16, 4   ;;  %s5157_s18 = smov %s4673_s19 }
 0x841   : > { %s5158_s19 = smov %s4677_s20  ;;  %s5159_s20 = smov %s4844_s27 }
 0x842   : > { %s5160_s21 = smov %s4835_s16  ;;  %21 = sbr.rel (!%p19_p2) target bundleno = 6 (0x6), region = 93 }
 0x849   :  { %3406 = vsyncpa [#allocation3], 1 }
 0x84a   :  { %3408 = vsyncpa [#allocation3 + $0x1], 1 }
 0x84b   :  { %3409 = vsyncpa [#allocation6], 1 }
 0x84c   :  { %3410 = vsyncpa [#allocation4], 1 }
 0x84d   :  { %3412 = vsyncpa [#allocation4 + $0x1], 1 }

</bundles_post_ra>
